<compile_context>
chip_gen: v7x
topology: tpu7x:2x2x1
jax: 0.10.0
libtpu: 0.0.40
codegen_flags: <defaults>
</compile_context>

<pallas_src>
import functools
import numpy as np
import jax
import jax.numpy as jnp
from jax import lax
from jax.experimental import pallas as pl
from jax.experimental.pallas import tpu as pltpu


# --------------------------------------------------------------------------- #
# Fused decoder kernel: input projection + LSTM recurrence + classifier
# --------------------------------------------------------------------------- #
def decoder_kernel(x_ref, w_ih_ref, w_hh_ref, b_ref, w_cls_ref, b_cls_ref,
                   logits_ref, gx_sc, h_all_sc, h_sc, c_sc):
    # x_ref      : (T1*B, E)  time-major flattened inputs (row = t*B + b)
    # w_ih_ref   : (E, 4H)    transposed, PyTorch gate order i, f, g, o
    # w_hh_ref   : (H, 4H)
    # b_ref      : (1, 4H)    b_ih + b_hh
    # w_cls_ref  : (H, V)
    # b_cls_ref  : (1, V)
    # logits_ref : (T1*B, V)  time-major logits
    T1, B, H = h_all_sc.shape

    # --- hoisted input projection (one big MXU matmul, bias folded in) ----- #
    gx = (jnp.dot(x_ref[...], w_ih_ref[...],
                  preferred_element_type=jnp.float32) + b_ref[...])   # (T1*B, 4H)
    gx_sc[...] = gx.reshape(T1, B, 4 * H)

    h_sc[...] = jnp.zeros_like(h_sc)
    c_sc[...] = jnp.zeros_like(c_sc)
    w_hh = w_hh_ref[...]                       # hoisted weight load

    # --- sequential recurrence: only h_prev @ W_hh on the critical path ---- #
    def step(t, carry):
        gates = gx_sc[t] + jnp.dot(h_sc[...], w_hh,
                                   preferred_element_type=jnp.float32)  # (B, 4H)
        i = jax.nn.sigmoid(gates[:, 0 * H:1 * H])
        f = jax.nn.sigmoid(gates[:, 1 * H:2 * H])
        g = jnp.tanh(gates[:, 2 * H:3 * H])
        o = jax.nn.sigmoid(gates[:, 3 * H:4 * H])
        c = f * c_sc[...] + i * g
        h = o * jnp.tanh(c)
        c_sc[...] = c
        h_sc[...] = h
        h_all_sc[t] = h
        return carry

    lax.fori_loop(0, T1, step, 0, unroll=True)

    # --- fused classifier epilogue: (T1*B, H) @ (H, V) + b ----------------- #
    h_flat = h_all_sc[...].reshape(T1 * B, H)
    logits_ref[...] = (jnp.dot(h_flat, w_cls_ref[...],
                               preferred_element_type=jnp.float32)
                       + b_cls_ref[...])


def run_decoder(x_flat, w_ih, w_hh, b, w_cls, b_cls, *, T1, B):
    NB, _ = x_flat.shape
    H = w_hh.shape[0]
    V = w_cls.shape[1]
    return pl.pallas_call(
        decoder_kernel,
        out_shape=jax.ShapeDtypeStruct((NB, V), jnp.float32),
        in_specs=[pl.BlockSpec(memory_space=pltpu.MemorySpace.VMEM)] * 6,
        out_specs=pl.BlockSpec(memory_space=pltpu.MemorySpace.VMEM),
        scratch_shapes=[
            pltpu.VMEM((T1, B, 4 * H), jnp.float32),   # precomputed input gates
            pltpu.VMEM((T1, B, H), jnp.float32),       # all hidden states
            pltpu.VMEM((B, H), jnp.float32),           # h carry
            pltpu.VMEM((B, H), jnp.float32),           # c carry
        ],
    )(x_flat, w_ih, w_hh, b, w_cls, b_cls)


# --------------------------------------------------------------------------- #
# Decoder module (parameters initialized deterministically in-script)
# --------------------------------------------------------------------------- #
class DecoderPallas:
    def __init__(self, vocab_size, embedding_size, lstm_size, key):
        k = jax.random.split(key, 7)
        s = 1.0 / np.sqrt(lstm_size)
        # nn.Embedding(vocab_size, embedding_size)
        self.embedding = jax.random.normal(
            k[0], (vocab_size, embedding_size), jnp.float32)
        # nn.LSTM(embedding_size, lstm_size, 1, batch_first=True)
        # stored transposed (in_dim, 4H) so the kernel does x @ W; gate order i,f,g,o
        self.w_ih = jax.random.uniform(
            k[1], (embedding_size, 4 * lstm_size), jnp.float32, -s, s)
        self.w_hh = jax.random.uniform(
            k[2], (lstm_size, 4 * lstm_size), jnp.float32, -s, s)
        self.b = (jax.random.uniform(k[3], (1, 4 * lstm_size), jnp.float32, -s, s)
                  + jax.random.uniform(k[4], (1, 4 * lstm_size), jnp.float32, -s, s))
        # nn.Linear(lstm_size, vocab_size)
        self.w_cls = jax.random.uniform(
            k[5], (lstm_size, vocab_size), jnp.float32, -s, s)
        self.b_cls = jax.random.uniform(
            k[6], (1, vocab_size), jnp.float32, -s, s)

    @staticmethod
    @functools.lru_cache(maxsize=None)
    def _packed_flat_indices(lengths, max_t, batch):
        # pack_padded_sequence(batch_first=True) data ordering: for each
        # timestep t, the still-active batch rows in batch order.  Rows of the
        # kernel's time-major logits are flat index t*batch + b.  Cached so the
        # host-side loop runs once per (lengths, shape) configuration.
        idx = [t * batch + b
               for t in range(max_t)
               for b in range(batch)
               if lengths[b] > t]
        return jnp.asarray(idx, jnp.int32)

    def forward(self, features, captions, lengths):
        # features: (B, E) f32; captions: (B, T) int32; lengths: python list,
        # sorted descending (pack_padded_sequence enforce_sorted=True semantics).
        emb = jnp.take(self.embedding, captions, axis=0)             # (B, T, E) glue gather
        vec = jnp.concatenate([features[:, None, :], emb], axis=1)   # (B, T+1, E)
        B, T1, E = vec.shape
        x_flat = jnp.transpose(vec, (1, 0, 2)).reshape(T1 * B, E)    # time-major, flat
        logits = run_decoder(x_flat, self.w_ih, self.w_hh, self.b,
                             self.w_cls, self.b_cls, T1=T1, B=B)     # (T1*B, V)
        flat_idx = self._packed_flat_indices(tuple(int(l) for l in lengths), T1, B)
        return jnp.take(logits, flat_idx, axis=0)                    # (N, vocab)


# --------------------------------------------------------------------------- #
# Pure-JAX reference (same math) for correctness verification
# --------------------------------------------------------------------------- #
def reference_forward(dec, features, captions, lengths):
    emb = jnp.take(dec.embedding, captions, axis=0)
    vec = jnp.concatenate([features[:, None, :], emb], axis=1)
    B, T1, _ = vec.shape
    H = dec.w_hh.shape[0]
    h = jnp.zeros((B, H), jnp.float32)
    c = jnp.zeros((B, H), jnp.float32)
    hs = []
    for t in range(T1):
        gates = vec[:, t] @ dec.w_ih + h @ dec.w_hh + dec.b
        i = jax.nn.sigmoid(gates[:, :H])
        f = jax.nn.sigmoid(gates[:, H:2 * H])
        g = jnp.tanh(gates[:, 2 * H:3 * H])
        o = jax.nn.sigmoid(gates[:, 3 * H:])
        c = f * c + i * g
        h = o * jnp.tanh(c)
        hs.append(h)
    h_all = jnp.stack(hs, 0).reshape(T1 * B, H)                      # time-major flat
    flat_idx = DecoderPallas._packed_flat_indices(tuple(int(l) for l in lengths), T1, B)
    packed = jnp.take(h_all, flat_idx, axis=0)
    return packed @ dec.w_cls + dec.b_cls


if __name__ == "__main__":
    vocab_size, embedding_size, lstm_size = 256, 128, 128
    batch, seq = 8, 8

    dec = DecoderPallas(vocab_size, embedding_size, lstm_size, jax.random.PRNGKey(0))

    kf, kc = jax.random.split(jax.random.PRNGKey(1))
    features = jax.random.normal(kf, (batch, embedding_size), jnp.float32)
    captions = jax.random.randint(kc, (batch, seq), 0, vocab_size, jnp.int32)
    lengths = [9, 8, 7, 6, 5, 4, 3, 2]   # sorted descending, max == seq + 1

    out = dec.forward(features, captions, lengths)
    out = jax.block_until_ready(out)

    ref = reference_forward(dec, features, captions, lengths)
    assert out.shape == (sum(lengths), vocab_size)
    np.testing.assert_allclose(np.asarray(out), np.asarray(ref),
                               rtol=2e-5, atol=2e-5)
    print("KERNEL_OK")
</pallas_src>

<mosaic_0001>
module attributes {stable_mosaic.version = 11 : i64} {
  func.func @decoder_kernel(%arg0: memref<72x128xf32, #tpu.memory_space<vmem>>, %arg1: memref<128x512xf32, #tpu.memory_space<vmem>>, %arg2: memref<128x512xf32, #tpu.memory_space<vmem>>, %arg3: memref<1x512xf32, #tpu.memory_space<vmem>>, %arg4: memref<128x256xf32, #tpu.memory_space<vmem>>, %arg5: memref<1x256xf32, #tpu.memory_space<vmem>>, %arg6: memref<72x256xf32, #tpu.memory_space<vmem>>, %arg7: memref<9x8x512xf32, #tpu.memory_space<vmem>>, %arg8: memref<9x8x128xf32, #tpu.memory_space<vmem>>, %arg9: memref<8x128xf32, #tpu.memory_space<vmem>>, %arg10: memref<8x128xf32, #tpu.memory_space<vmem>>) attributes {dimension_semantics = [], scalar_prefetch = 0 : i64, scratch_operands = 4 : i64, tpu.core_type = #tpu.core_type<tc>} {
    %c0 = arith.constant 0 : index
    %c0_0 = arith.constant 0 : index
    %0 = vector.load %arg0[%c0, %c0_0] : memref<72x128xf32, #tpu.memory_space<vmem>>, vector<72x128xf32>
    %c0_1 = arith.constant 0 : index
    %c0_2 = arith.constant 0 : index
    %1 = vector.load %arg1[%c0_1, %c0_2] : memref<128x512xf32, #tpu.memory_space<vmem>>, vector<128x512xf32>
    %cst = arith.constant dense<0.000000e+00> : vector<72x512xf32>
    %2 = tpu.matmul %0, %1, %cst {dimension_numbers = #tpu.dot_dimension_numbers<[1], [0], [0], [1], [0, 0, 1, 1], [], []>} : vector<72x128xf32>, vector<128x512xf32>, vector<72x512xf32> -> vector<72x512xf32>
    %c0_3 = arith.constant 0 : index
    %c0_4 = arith.constant 0 : index
    %3 = vector.load %arg3[%c0_3, %c0_4] : memref<1x512xf32, #tpu.memory_space<vmem>>, vector<1x512xf32>
    %4 = vector.broadcast %3 : vector<1x512xf32> to vector<72x512xf32>
    %5 = arith.addf %2, %4 : vector<72x512xf32>
    %6 = vector.shape_cast %5 : vector<72x512xf32> to vector<9x8x512xf32>
    %c0_5 = arith.constant 0 : index
    %c0_6 = arith.constant 0 : index
    %c0_7 = arith.constant 0 : index
    %7 = vector.load %arg7[%c0_5, %c0_6, %c0_7] : memref<9x8x512xf32, #tpu.memory_space<vmem>>, vector<9x8x512xf32>
    tpu.vector_store %arg7[%c0_5, %c0_6, %c0_7], %6 {strides = array<i32>} : memref<9x8x512xf32, #tpu.memory_space<vmem>>, vector<9x8x512xf32>,
    %cst_8 = arith.constant 0.000000e+00 : f32
    %8 = vector.broadcast %cst_8 : f32 to vector<8x128xf32>
    %c0_9 = arith.constant 0 : index
    %c0_10 = arith.constant 0 : index
    %9 = vector.load %arg9[%c0_9, %c0_10] : memref<8x128xf32, #tpu.memory_space<vmem>>, vector<8x128xf32>
    tpu.vector_store %arg9[%c0_9, %c0_10], %8 {strides = array<i32>} : memref<8x128xf32, #tpu.memory_space<vmem>>, vector<8x128xf32>,
    %cst_11 = arith.constant 0.000000e+00 : f32
    %10 = vector.broadcast %cst_11 : f32 to vector<8x128xf32>
    %c0_12 = arith.constant 0 : index
    %c0_13 = arith.constant 0 : index
    %11 = vector.load %arg10[%c0_12, %c0_13] : memref<8x128xf32, #tpu.memory_space<vmem>>, vector<8x128xf32>
    tpu.vector_store %arg10[%c0_12, %c0_13], %10 {strides = array<i32>} : memref<8x128xf32, #tpu.memory_space<vmem>>, vector<8x128xf32>,
    %c0_14 = arith.constant 0 : index
    %c0_15 = arith.constant 0 : index
    %12 = vector.load %arg2[%c0_14, %c0_15] : memref<128x512xf32, #tpu.memory_space<vmem>>, vector<128x512xf32>
    %c0_i32 = arith.constant 0 : i32
    %13 = arith.index_cast %c0_i32 : i32 to index
    %c0_16 = arith.constant 0 : index
    %c0_17 = arith.constant 0 : index
    %14 = vector.load %arg7[%13, %c0_16, %c0_17] : memref<9x8x512xf32, #tpu.memory_space<vmem>>, vector<1x8x512xf32>
    %15 = vector.shape_cast %14 : vector<1x8x512xf32> to vector<8x512xf32>
    %c0_18 = arith.constant 0 : index
    %c0_19 = arith.constant 0 : index
    %16 = vector.load %arg9[%c0_18, %c0_19] : memref<8x128xf32, #tpu.memory_space<vmem>>, vector<8x128xf32>
    %cst_20 = arith.constant dense<0.000000e+00> : vector<8x512xf32>
    %17 = tpu.matmul %16, %12, %cst_20 {dimension_numbers = #tpu.dot_dimension_numbers<[1], [0], [0], [1], [0, 0, 1, 1], [], []>} : vector<8x128xf32>, vector<128x512xf32>, vector<8x512xf32> -> vector<8x512xf32>
    %18 = arith.addf %15, %17 : vector<8x512xf32>
    %19 = vector.extract_strided_slice %18 {offsets = [0, 0], sizes = [8, 128], strides = [1, 1]} : vector<8x512xf32> to vector<8x128xf32>
    %20 = arith.negf %19 : vector<8x128xf32>
    %21 = math.exp %20 : vector<8x128xf32>
    %cst_21 = arith.constant 1.000000e+00 : f32
    %22 = vector.broadcast %cst_21 : f32 to vector<8x128xf32>
    %23 = arith.addf %22, %21 : vector<8x128xf32>
    %24 = arith.divf %22, %23 : vector<8x128xf32>
    %25 = vector.extract_strided_slice %18 {offsets = [0, 128], sizes = [8, 128], strides = [1, 1]} : vector<8x512xf32> to vector<8x128xf32>
    %26 = arith.negf %25 : vector<8x128xf32>
    %27 = math.exp %26 : vector<8x128xf32>
    %cst_22 = arith.constant 1.000000e+00 : f32
    %28 = vector.broadcast %cst_22 : f32 to vector<8x128xf32>
    %29 = arith.addf %28, %27 : vector<8x128xf32>
    %30 = arith.divf %28, %29 : vector<8x128xf32>
    %31 = vector.extract_strided_slice %18 {offsets = [0, 256], sizes = [8, 128], strides = [1, 1]} : vector<8x512xf32> to vector<8x128xf32>
    %32 = math.tanh %31 : vector<8x128xf32>
    %33 = vector.extract_strided_slice %18 {offsets = [0, 384], sizes = [8, 128], strides = [1, 1]} : vector<8x512xf32> to vector<8x128xf32>
    %34 = arith.negf %33 : vector<8x128xf32>
    %35 = math.exp %34 : vector<8x128xf32>
    %cst_23 = arith.constant 1.000000e+00 : f32
    %36 = vector.broadcast %cst_23 : f32 to vector<8x128xf32>
    %37 = arith.addf %36, %35 : vector<8x128xf32>
    %38 = arith.divf %36, %37 : vector<8x128xf32>
    %c0_24 = arith.constant 0 : index
    %c0_25 = arith.constant 0 : index
    %39 = vector.load %arg10[%c0_24, %c0_25] : memref<8x128xf32, #tpu.memory_space<vmem>>, vector<8x128xf32>
    %40 = arith.mulf %30, %39 : vector<8x128xf32>
    %41 = arith.mulf %24, %32 : vector<8x128xf32>
    %42 = arith.addf %40, %41 : vector<8x128xf32>
    %43 = math.tanh %42 : vector<8x128xf32>
    %44 = arith.mulf %38, %43 : vector<8x128xf32>
    %c0_26 = arith.constant 0 : index
    %c0_27 = arith.constant 0 : index
    %45 = vector.load %arg10[%c0_26, %c0_27] : memref<8x128xf32, #tpu.memory_space<vmem>>, vector<8x128xf32>
    tpu.vector_store %arg10[%c0_26, %c0_27], %42 {strides = array<i32>} : memref<8x128xf32, #tpu.memory_space<vmem>>, vector<8x128xf32>,
    %c0_28 = arith.constant 0 : index
    %c0_29 = arith.constant 0 : index
    %46 = vector.load %arg9[%c0_28, %c0_29] : memref<8x128xf32, #tpu.memory_space<vmem>>, vector<8x128xf32>
    tpu.vector_store %arg9[%c0_28, %c0_29], %44 {strides = array<i32>} : memref<8x128xf32, #tpu.memory_space<vmem>>, vector<8x128xf32>,
    %47 = arith.index_cast %c0_i32 : i32 to index
    %c0_30 = arith.constant 0 : index
    %c0_31 = arith.constant 0 : index
    %48 = vector.load %arg8[%47, %c0_30, %c0_31] : memref<9x8x128xf32, #tpu.memory_space<vmem>>, vector<1x8x128xf32>
    %49 = vector.shape_cast %48 : vector<1x8x128xf32> to vector<8x128xf32>
    %50 = vector.shape_cast %44 : vector<8x128xf32> to vector<1x8x128xf32>
    tpu.vector_store %arg8[%47, %c0_30, %c0_31], %50 {strides = array<i32>} : memref<9x8x128xf32, #tpu.memory_space<vmem>>, vector<1x8x128xf32>,
    %c1_i32 = arith.constant 1 : i32
    %51 = arith.index_cast %c1_i32 : i32 to index
    %c0_32 = arith.constant 0 : index
    %c0_33 = arith.constant 0 : index
    %52 = vector.load %arg7[%51, %c0_32, %c0_33] : memref<9x8x512xf32, #tpu.memory_space<vmem>>, vector<1x8x512xf32>
    %53 = vector.shape_cast %52 : vector<1x8x512xf32> to vector<8x512xf32>
    %c0_34 = arith.constant 0 : index
    %c0_35 = arith.constant 0 : index
    %54 = vector.load %arg9[%c0_34, %c0_35] : memref<8x128xf32, #tpu.memory_space<vmem>>, vector<8x128xf32>
    %cst_36 = arith.constant dense<0.000000e+00> : vector<8x512xf32>
    %55 = tpu.matmul %54, %12, %cst_36 {dimension_numbers = #tpu.dot_dimension_numbers<[1], [0], [0], [1], [0, 0, 1, 1], [], []>} : vector<8x128xf32>, vector<128x512xf32>, vector<8x512xf32> -> vector<8x512xf32>
    %56 = arith.addf %53, %55 : vector<8x512xf32>
    %57 = vector.extract_strided_slice %56 {offsets = [0, 0], sizes = [8, 128], strides = [1, 1]} : vector<8x512xf32> to vector<8x128xf32>
    %58 = arith.negf %57 : vector<8x128xf32>
    %59 = math.exp %58 : vector<8x128xf32>
    %cst_37 = arith.constant 1.000000e+00 : f32
    %60 = vector.broadcast %cst_37 : f32 to vector<8x128xf32>
    %61 = arith.addf %60, %59 : vector<8x128xf32>
    %62 = arith.divf %60, %61 : vector<8x128xf32>
    %63 = vector.extract_strided_slice %56 {offsets = [0, 128], sizes = [8, 128], strides = [1, 1]} : vector<8x512xf32> to vector<8x128xf32>
    %64 = arith.negf %63 : vector<8x128xf32>
    %65 = math.exp %64 : vector<8x128xf32>
    %cst_38 = arith.constant 1.000000e+00 : f32
    %66 = vector.broadcast %cst_38 : f32 to vector<8x128xf32>
    %67 = arith.addf %66, %65 : vector<8x128xf32>
    %68 = arith.divf %66, %67 : vector<8x128xf32>
    %69 = vector.extract_strided_slice %56 {offsets = [0, 256], sizes = [8, 128], strides = [1, 1]} : vector<8x512xf32> to vector<8x128xf32>
    %70 = math.tanh %69 : vector<8x128xf32>
    %71 = vector.extract_strided_slice %56 {offsets = [0, 384], sizes = [8, 128], strides = [1, 1]} : vector<8x512xf32> to vector<8x128xf32>
    %72 = arith.negf %71 : vector<8x128xf32>
    %73 = math.exp %72 : vector<8x128xf32>
    %cst_39 = arith.constant 1.000000e+00 : f32
    %74 = vector.broadcast %cst_39 : f32 to vector<8x128xf32>
    %75 = arith.addf %74, %73 : vector<8x128xf32>
    %76 = arith.divf %74, %75 : vector<8x128xf32>
    %c0_40 = arith.constant 0 : index
    %c0_41 = arith.constant 0 : index
    %77 = vector.load %arg10[%c0_40, %c0_41] : memref<8x128xf32, #tpu.memory_space<vmem>>, vector<8x128xf32>
    %78 = arith.mulf %68, %77 : vector<8x128xf32>
    %79 = arith.mulf %62, %70 : vector<8x128xf32>
    %80 = arith.addf %78, %79 : vector<8x128xf32>
    %81 = math.tanh %80 : vector<8x128xf32>
    %82 = arith.mulf %76, %81 : vector<8x128xf32>
    %c0_42 = arith.constant 0 : index
    %c0_43 = arith.constant 0 : index
    %83 = vector.load %arg10[%c0_42, %c0_43] : memref<8x128xf32, #tpu.memory_space<vmem>>, vector<8x128xf32>
    tpu.vector_store %arg10[%c0_42, %c0_43], %80 {strides = array<i32>} : memref<8x128xf32, #tpu.memory_space<vmem>>, vector<8x128xf32>,
    %c0_44 = arith.constant 0 : index
    %c0_45 = arith.constant 0 : index
    %84 = vector.load %arg9[%c0_44, %c0_45] : memref<8x128xf32, #tpu.memory_space<vmem>>, vector<8x128xf32>
    tpu.vector_store %arg9[%c0_44, %c0_45], %82 {strides = array<i32>} : memref<8x128xf32, #tpu.memory_space<vmem>>, vector<8x128xf32>,
    %85 = arith.index_cast %c1_i32 : i32 to index
    %c0_46 = arith.constant 0 : index
    %c0_47 = arith.constant 0 : index
    %86 = vector.load %arg8[%85, %c0_46, %c0_47] : memref<9x8x128xf32, #tpu.memory_space<vmem>>, vector<1x8x128xf32>
    %87 = vector.shape_cast %86 : vector<1x8x128xf32> to vector<8x128xf32>
    %88 = vector.shape_cast %82 : vector<8x128xf32> to vector<1x8x128xf32>
    tpu.vector_store %arg8[%85, %c0_46, %c0_47], %88 {strides = array<i32>} : memref<9x8x128xf32, #tpu.memory_space<vmem>>, vector<1x8x128xf32>,
    %c2_i32 = arith.constant 2 : i32
    %89 = arith.index_cast %c2_i32 : i32 to index
    %c0_48 = arith.constant 0 : index
    %c0_49 = arith.constant 0 : index
    %90 = vector.load %arg7[%89, %c0_48, %c0_49] : memref<9x8x512xf32, #tpu.memory_space<vmem>>, vector<1x8x512xf32>
    %91 = vector.shape_cast %90 : vector<1x8x512xf32> to vector<8x512xf32>
    %c0_50 = arith.constant 0 : index
    %c0_51 = arith.constant 0 : index
    %92 = vector.load %arg9[%c0_50, %c0_51] : memref<8x128xf32, #tpu.memory_space<vmem>>, vector<8x128xf32>
    %cst_52 = arith.constant dense<0.000000e+00> : vector<8x512xf32>
    %93 = tpu.matmul %92, %12, %cst_52 {dimension_numbers = #tpu.dot_dimension_numbers<[1], [0], [0], [1], [0, 0, 1, 1], [], []>} : vector<8x128xf32>, vector<128x512xf32>, vector<8x512xf32> -> vector<8x512xf32>
    %94 = arith.addf %91, %93 : vector<8x512xf32>
    %95 = vector.extract_strided_slice %94 {offsets = [0, 0], sizes = [8, 128], strides = [1, 1]} : vector<8x512xf32> to vector<8x128xf32>
    %96 = arith.negf %95 : vector<8x128xf32>
    %97 = math.exp %96 : vector<8x128xf32>
    %cst_53 = arith.constant 1.000000e+00 : f32
    %98 = vector.broadcast %cst_53 : f32 to vector<8x128xf32>
    %99 = arith.addf %98, %97 : vector<8x128xf32>
    %100 = arith.divf %98, %99 : vector<8x128xf32>
    %101 = vector.extract_strided_slice %94 {offsets = [0, 128], sizes = [8, 128], strides = [1, 1]} : vector<8x512xf32> to vector<8x128xf32>
    %102 = arith.negf %101 : vector<8x128xf32>
    %103 = math.exp %102 : vector<8x128xf32>
    %cst_54 = arith.constant 1.000000e+00 : f32
    %104 = vector.broadcast %cst_54 : f32 to vector<8x128xf32>
    %105 = arith.addf %104, %103 : vector<8x128xf32>
    %106 = arith.divf %104, %105 : vector<8x128xf32>
    %107 = vector.extract_strided_slice %94 {offsets = [0, 256], sizes = [8, 128], strides = [1, 1]} : vector<8x512xf32> to vector<8x128xf32>
    %108 = math.tanh %107 : vector<8x128xf32>
    %109 = vector.extract_strided_slice %94 {offsets = [0, 384], sizes = [8, 128], strides = [1, 1]} : vector<8x512xf32> to vector<8x128xf32>
    %110 = arith.negf %109 : vector<8x128xf32>
    %111 = math.exp %110 : vector<8x128xf32>
    %cst_55 = arith.constant 1.000000e+00 : f32
    %112 = vector.broadcast %cst_55 : f32 to vector<8x128xf32>
    %113 = arith.addf %112, %111 : vector<8x128xf32>
    %114 = arith.divf %112, %113 : vector<8x128xf32>
    %c0_56 = arith.constant 0 : index
    %c0_57 = arith.constant 0 : index
    %115 = vector.load %arg10[%c0_56, %c0_57] : memref<8x128xf32, #tpu.memory_space<vmem>>, vector<8x128xf32>
    %116 = arith.mulf %106, %115 : vector<8x128xf32>
    %117 = arith.mulf %100, %108 : vector<8x128xf32>
    %118 = arith.addf %116, %117 : vector<8x128xf32>
    %119 = math.tanh %118 : vector<8x128xf32>
    %120 = arith.mulf %114, %119 : vector<8x128xf32>
    %c0_58 = arith.constant 0 : index
    %c0_59 = arith.constant 0 : index
    %121 = vector.load %arg10[%c0_58, %c0_59] : memref<8x128xf32, #tpu.memory_space<vmem>>, vector<8x128xf32>
    tpu.vector_store %arg10[%c0_58, %c0_59], %118 {strides = array<i32>} : memref<8x128xf32, #tpu.memory_space<vmem>>, vector<8x128xf32>,
    %c0_60 = arith.constant 0 : index
    %c0_61 = arith.constant 0 : index
    %122 = vector.load %arg9[%c0_60, %c0_61] : memref<8x128xf32, #tpu.memory_space<vmem>>, vector<8x128xf32>
    tpu.vector_store %arg9[%c0_60, %c0_61], %120 {strides = array<i32>} : memref<8x128xf32, #tpu.memory_space<vmem>>, vector<8x128xf32>,
    %123 = arith.index_cast %c2_i32 : i32 to index
    %c0_62 = arith.constant 0 : index
    %c0_63 = arith.constant 0 : index
    %124 = vector.load %arg8[%123, %c0_62, %c0_63] : memref<9x8x128xf32, #tpu.memory_space<vmem>>, vector<1x8x128xf32>
    %125 = vector.shape_cast %124 : vector<1x8x128xf32> to vector<8x128xf32>
    %126 = vector.shape_cast %120 : vector<8x128xf32> to vector<1x8x128xf32>
    tpu.vector_store %arg8[%123, %c0_62, %c0_63], %126 {strides = array<i32>} : memref<9x8x128xf32, #tpu.memory_space<vmem>>, vector<1x8x128xf32>,
    %c3_i32 = arith.constant 3 : i32
    %127 = arith.index_cast %c3_i32 : i32 to index
    %c0_64 = arith.constant 0 : index
    %c0_65 = arith.constant 0 : index
    %128 = vector.load %arg7[%127, %c0_64, %c0_65] : memref<9x8x512xf32, #tpu.memory_space<vmem>>, vector<1x8x512xf32>
    %129 = vector.shape_cast %128 : vector<1x8x512xf32> to vector<8x512xf32>
    %c0_66 = arith.constant 0 : index
    %c0_67 = arith.constant 0 : index
    %130 = vector.load %arg9[%c0_66, %c0_67] : memref<8x128xf32, #tpu.memory_space<vmem>>, vector<8x128xf32>
    %cst_68 = arith.constant dense<0.000000e+00> : vector<8x512xf32>
    %131 = tpu.matmul %130, %12, %cst_68 {dimension_numbers = #tpu.dot_dimension_numbers<[1], [0], [0], [1], [0, 0, 1, 1], [], []>} : vector<8x128xf32>, vector<128x512xf32>, vector<8x512xf32> -> vector<8x512xf32>
    %132 = arith.addf %129, %131 : vector<8x512xf32>
    %133 = vector.extract_strided_slice %132 {offsets = [0, 0], sizes = [8, 128], strides = [1, 1]} : vector<8x512xf32> to vector<8x128xf32>
    %134 = arith.negf %133 : vector<8x128xf32>
    %135 = math.exp %134 : vector<8x128xf32>
    %cst_69 = arith.constant 1.000000e+00 : f32
    %136 = vector.broadcast %cst_69 : f32 to vector<8x128xf32>
    %137 = arith.addf %136, %135 : vector<8x128xf32>
    %138 = arith.divf %136, %137 : vector<8x128xf32>
    %139 = vector.extract_strided_slice %132 {offsets = [0, 128], sizes = [8, 128], strides = [1, 1]} : vector<8x512xf32> to vector<8x128xf32>
    %140 = arith.negf %139 : vector<8x128xf32>
    %141 = math.exp %140 : vector<8x128xf32>
    %cst_70 = arith.constant 1.000000e+00 : f32
    %142 = vector.broadcast %cst_70 : f32 to vector<8x128xf32>
    %143 = arith.addf %142, %141 : vector<8x128xf32>
    %144 = arith.divf %142, %143 : vector<8x128xf32>
    %145 = vector.extract_strided_slice %132 {offsets = [0, 256], sizes = [8, 128], strides = [1, 1]} : vector<8x512xf32> to vector<8x128xf32>
    %146 = math.tanh %145 : vector<8x128xf32>
    %147 = vector.extract_strided_slice %132 {offsets = [0, 384], sizes = [8, 128], strides = [1, 1]} : vector<8x512xf32> to vector<8x128xf32>
    %148 = arith.negf %147 : vector<8x128xf32>
    %149 = math.exp %148 : vector<8x128xf32>
    %cst_71 = arith.constant 1.000000e+00 : f32
    %150 = vector.broadcast %cst_71 : f32 to vector<8x128xf32>
    %151 = arith.addf %150, %149 : vector<8x128xf32>
    %152 = arith.divf %150, %151 : vector<8x128xf32>
    %c0_72 = arith.constant 0 : index
    %c0_73 = arith.constant 0 : index
    %153 = vector.load %arg10[%c0_72, %c0_73] : memref<8x128xf32, #tpu.memory_space<vmem>>, vector<8x128xf32>
    %154 = arith.mulf %144, %153 : vector<8x128xf32>
    %155 = arith.mulf %138, %146 : vector<8x128xf32>
    %156 = arith.addf %154, %155 : vector<8x128xf32>
    %157 = math.tanh %156 : vector<8x128xf32>
    %158 = arith.mulf %152, %157 : vector<8x128xf32>
    %c0_74 = arith.constant 0 : index
    %c0_75 = arith.constant 0 : index
    %159 = vector.load %arg10[%c0_74, %c0_75] : memref<8x128xf32, #tpu.memory_space<vmem>>, vector<8x128xf32>
    tpu.vector_store %arg10[%c0_74, %c0_75], %156 {strides = array<i32>} : memref<8x128xf32, #tpu.memory_space<vmem>>, vector<8x128xf32>,
    %c0_76 = arith.constant 0 : index
    %c0_77 = arith.constant 0 : index
    %160 = vector.load %arg9[%c0_76, %c0_77] : memref<8x128xf32, #tpu.memory_space<vmem>>, vector<8x128xf32>
    tpu.vector_store %arg9[%c0_76, %c0_77], %158 {strides = array<i32>} : memref<8x128xf32, #tpu.memory_space<vmem>>, vector<8x128xf32>,
    %161 = arith.index_cast %c3_i32 : i32 to index
    %c0_78 = arith.constant 0 : index
    %c0_79 = arith.constant 0 : index
    %162 = vector.load %arg8[%161, %c0_78, %c0_79] : memref<9x8x128xf32, #tpu.memory_space<vmem>>, vector<1x8x128xf32>
    %163 = vector.shape_cast %162 : vector<1x8x128xf32> to vector<8x128xf32>
    %164 = vector.shape_cast %158 : vector<8x128xf32> to vector<1x8x128xf32>
    tpu.vector_store %arg8[%161, %c0_78, %c0_79], %164 {strides = array<i32>} : memref<9x8x128xf32, #tpu.memory_space<vmem>>, vector<1x8x128xf32>,
    %c4_i32 = arith.constant 4 : i32
    %165 = arith.index_cast %c4_i32 : i32 to index
    %c0_80 = arith.constant 0 : index
    %c0_81 = arith.constant 0 : index
    %166 = vector.load %arg7[%165, %c0_80, %c0_81] : memref<9x8x512xf32, #tpu.memory_space<vmem>>, vector<1x8x512xf32>
    %167 = vector.shape_cast %166 : vector<1x8x512xf32> to vector<8x512xf32>
    %c0_82 = arith.constant 0 : index
    %c0_83 = arith.constant 0 : index
    %168 = vector.load %arg9[%c0_82, %c0_83] : memref<8x128xf32, #tpu.memory_space<vmem>>, vector<8x128xf32>
    %cst_84 = arith.constant dense<0.000000e+00> : vector<8x512xf32>
    %169 = tpu.matmul %168, %12, %cst_84 {dimension_numbers = #tpu.dot_dimension_numbers<[1], [0], [0], [1], [0, 0, 1, 1], [], []>} : vector<8x128xf32>, vector<128x512xf32>, vector<8x512xf32> -> vector<8x512xf32>
    %170 = arith.addf %167, %169 : vector<8x512xf32>
    %171 = vector.extract_strided_slice %170 {offsets = [0, 0], sizes = [8, 128], strides = [1, 1]} : vector<8x512xf32> to vector<8x128xf32>
    %172 = arith.negf %171 : vector<8x128xf32>
    %173 = math.exp %172 : vector<8x128xf32>
    %cst_85 = arith.constant 1.000000e+00 : f32
    %174 = vector.broadcast %cst_85 : f32 to vector<8x128xf32>
    %175 = arith.addf %174, %173 : vector<8x128xf32>
    %176 = arith.divf %174, %175 : vector<8x128xf32>
    %177 = vector.extract_strided_slice %170 {offsets = [0, 128], sizes = [8, 128], strides = [1, 1]} : vector<8x512xf32> to vector<8x128xf32>
    %178 = arith.negf %177 : vector<8x128xf32>
    %179 = math.exp %178 : vector<8x128xf32>
    %cst_86 = arith.constant 1.000000e+00 : f32
    %180 = vector.broadcast %cst_86 : f32 to vector<8x128xf32>
    %181 = arith.addf %180, %179 : vector<8x128xf32>
    %182 = arith.divf %180, %181 : vector<8x128xf32>
    %183 = vector.extract_strided_slice %170 {offsets = [0, 256], sizes = [8, 128], strides = [1, 1]} : vector<8x512xf32> to vector<8x128xf32>
    %184 = math.tanh %183 : vector<8x128xf32>
    %185 = vector.extract_strided_slice %170 {offsets = [0, 384], sizes = [8, 128], strides = [1, 1]} : vector<8x512xf32> to vector<8x128xf32>
    %186 = arith.negf %185 : vector<8x128xf32>
    %187 = math.exp %186 : vector<8x128xf32>
    %cst_87 = arith.constant 1.000000e+00 : f32
    %188 = vector.broadcast %cst_87 : f32 to vector<8x128xf32>
    %189 = arith.addf %188, %187 : vector<8x128xf32>
    %190 = arith.divf %188, %189 : vector<8x128xf32>
    %c0_88 = arith.constant 0 : index
    %c0_89 = arith.constant 0 : index
    %191 = vector.load %arg10[%c0_88, %c0_89] : memref<8x128xf32, #tpu.memory_space<vmem>>, vector<8x128xf32>
    %192 = arith.mulf %182, %191 : vector<8x128xf32>
    %193 = arith.mulf %176, %184 : vector<8x128xf32>
    %194 = arith.addf %192, %193 : vector<8x128xf32>
    %195 = math.tanh %194 : vector<8x128xf32>
    %196 = arith.mulf %190, %195 : vector<8x128xf32>
    %c0_90 = arith.constant 0 : index
    %c0_91 = arith.constant 0 : index
    %197 = vector.load %arg10[%c0_90, %c0_91] : memref<8x128xf32, #tpu.memory_space<vmem>>, vector<8x128xf32>
    tpu.vector_store %arg10[%c0_90, %c0_91], %194 {strides = array<i32>} : memref<8x128xf32, #tpu.memory_space<vmem>>, vector<8x128xf32>,
    %c0_92 = arith.constant 0 : index
    %c0_93 = arith.constant 0 : index
    %198 = vector.load %arg9[%c0_92, %c0_93] : memref<8x128xf32, #tpu.memory_space<vmem>>, vector<8x128xf32>
    tpu.vector_store %arg9[%c0_92, %c0_93], %196 {strides = array<i32>} : memref<8x128xf32, #tpu.memory_space<vmem>>, vector<8x128xf32>,
    %199 = arith.index_cast %c4_i32 : i32 to index
    %c0_94 = arith.constant 0 : index
    %c0_95 = arith.constant 0 : index
    %200 = vector.load %arg8[%199, %c0_94, %c0_95] : memref<9x8x128xf32, #tpu.memory_space<vmem>>, vector<1x8x128xf32>
    %201 = vector.shape_cast %200 : vector<1x8x128xf32> to vector<8x128xf32>
    %202 = vector.shape_cast %196 : vector<8x128xf32> to vector<1x8x128xf32>
    tpu.vector_store %arg8[%199, %c0_94, %c0_95], %202 {strides = array<i32>} : memref<9x8x128xf32, #tpu.memory_space<vmem>>, vector<1x8x128xf32>,
    %c5_i32 = arith.constant 5 : i32
    %203 = arith.index_cast %c5_i32 : i32 to index
    %c0_96 = arith.constant 0 : index
    %c0_97 = arith.constant 0 : index
    %204 = vector.load %arg7[%203, %c0_96, %c0_97] : memref<9x8x512xf32, #tpu.memory_space<vmem>>, vector<1x8x512xf32>
    %205 = vector.shape_cast %204 : vector<1x8x512xf32> to vector<8x512xf32>
    %c0_98 = arith.constant 0 : index
    %c0_99 = arith.constant 0 : index
    %206 = vector.load %arg9[%c0_98, %c0_99] : memref<8x128xf32, #tpu.memory_space<vmem>>, vector<8x128xf32>
    %cst_100 = arith.constant dense<0.000000e+00> : vector<8x512xf32>
    %207 = tpu.matmul %206, %12, %cst_100 {dimension_numbers = #tpu.dot_dimension_numbers<[1], [0], [0], [1], [0, 0, 1, 1], [], []>} : vector<8x128xf32>, vector<128x512xf32>, vector<8x512xf32> -> vector<8x512xf32>
    %208 = arith.addf %205, %207 : vector<8x512xf32>
    %209 = vector.extract_strided_slice %208 {offsets = [0, 0], sizes = [8, 128], strides = [1, 1]} : vector<8x512xf32> to vector<8x128xf32>
    %210 = arith.negf %209 : vector<8x128xf32>
    %211 = math.exp %210 : vector<8x128xf32>
    %cst_101 = arith.constant 1.000000e+00 : f32
    %212 = vector.broadcast %cst_101 : f32 to vector<8x128xf32>
    %213 = arith.addf %212, %211 : vector<8x128xf32>
    %214 = arith.divf %212, %213 : vector<8x128xf32>
    %215 = vector.extract_strided_slice %208 {offsets = [0, 128], sizes = [8, 128], strides = [1, 1]} : vector<8x512xf32> to vector<8x128xf32>
    %216 = arith.negf %215 : vector<8x128xf32>
    %217 = math.exp %216 : vector<8x128xf32>
    %cst_102 = arith.constant 1.000000e+00 : f32
    %218 = vector.broadcast %cst_102 : f32 to vector<8x128xf32>
    %219 = arith.addf %218, %217 : vector<8x128xf32>
    %220 = arith.divf %218, %219 : vector<8x128xf32>
    %221 = vector.extract_strided_slice %208 {offsets = [0, 256], sizes = [8, 128], strides = [1, 1]} : vector<8x512xf32> to vector<8x128xf32>
    %222 = math.tanh %221 : vector<8x128xf32>
    %223 = vector.extract_strided_slice %208 {offsets = [0, 384], sizes = [8, 128], strides = [1, 1]} : vector<8x512xf32> to vector<8x128xf32>
    %224 = arith.negf %223 : vector<8x128xf32>
    %225 = math.exp %224 : vector<8x128xf32>
    %cst_103 = arith.constant 1.000000e+00 : f32
    %226 = vector.broadcast %cst_103 : f32 to vector<8x128xf32>
    %227 = arith.addf %226, %225 : vector<8x128xf32>
    %228 = arith.divf %226, %227 : vector<8x128xf32>
    %c0_104 = arith.constant 0 : index
    %c0_105 = arith.constant 0 : index
    %229 = vector.load %arg10[%c0_104, %c0_105] : memref<8x128xf32, #tpu.memory_space<vmem>>, vector<8x128xf32>
    %230 = arith.mulf %220, %229 : vector<8x128xf32>
    %231 = arith.mulf %214, %222 : vector<8x128xf32>
    %232 = arith.addf %230, %231 : vector<8x128xf32>
    %233 = math.tanh %232 : vector<8x128xf32>
    %234 = arith.mulf %228, %233 : vector<8x128xf32>
    %c0_106 = arith.constant 0 : index
    %c0_107 = arith.constant 0 : index
    %235 = vector.load %arg10[%c0_106, %c0_107] : memref<8x128xf32, #tpu.memory_space<vmem>>, vector<8x128xf32>
    tpu.vector_store %arg10[%c0_106, %c0_107], %232 {strides = array<i32>} : memref<8x128xf32, #tpu.memory_space<vmem>>, vector<8x128xf32>,
    %c0_108 = arith.constant 0 : index
    %c0_109 = arith.constant 0 : index
    %236 = vector.load %arg9[%c0_108, %c0_109] : memref<8x128xf32, #tpu.memory_space<vmem>>, vector<8x128xf32>
    tpu.vector_store %arg9[%c0_108, %c0_109], %234 {strides = array<i32>} : memref<8x128xf32, #tpu.memory_space<vmem>>, vector<8x128xf32>,
    %237 = arith.index_cast %c5_i32 : i32 to index
    %c0_110 = arith.constant 0 : index
    %c0_111 = arith.constant 0 : index
    %238 = vector.load %arg8[%237, %c0_110, %c0_111] : memref<9x8x128xf32, #tpu.memory_space<vmem>>, vector<1x8x128xf32>
    %239 = vector.shape_cast %238 : vector<1x8x128xf32> to vector<8x128xf32>
    %240 = vector.shape_cast %234 : vector<8x128xf32> to vector<1x8x128xf32>
    tpu.vector_store %arg8[%237, %c0_110, %c0_111], %240 {strides = array<i32>} : memref<9x8x128xf32, #tpu.memory_space<vmem>>, vector<1x8x128xf32>,
    %c6_i32 = arith.constant 6 : i32
    %241 = arith.index_cast %c6_i32 : i32 to index
    %c0_112 = arith.constant 0 : index
    %c0_113 = arith.constant 0 : index
    %242 = vector.load %arg7[%241, %c0_112, %c0_113] : memref<9x8x512xf32, #tpu.memory_space<vmem>>, vector<1x8x512xf32>
    %243 = vector.shape_cast %242 : vector<1x8x512xf32> to vector<8x512xf32>
    %c0_114 = arith.constant 0 : index
    %c0_115 = arith.constant 0 : index
    %244 = vector.load %arg9[%c0_114, %c0_115] : memref<8x128xf32, #tpu.memory_space<vmem>>, vector<8x128xf32>
    %cst_116 = arith.constant dense<0.000000e+00> : vector<8x512xf32>
    %245 = tpu.matmul %244, %12, %cst_116 {dimension_numbers = #tpu.dot_dimension_numbers<[1], [0], [0], [1], [0, 0, 1, 1], [], []>} : vector<8x128xf32>, vector<128x512xf32>, vector<8x512xf32> -> vector<8x512xf32>
    %246 = arith.addf %243, %245 : vector<8x512xf32>
    %247 = vector.extract_strided_slice %246 {offsets = [0, 0], sizes = [8, 128], strides = [1, 1]} : vector<8x512xf32> to vector<8x128xf32>
    %248 = arith.negf %247 : vector<8x128xf32>
    %249 = math.exp %248 : vector<8x128xf32>
    %cst_117 = arith.constant 1.000000e+00 : f32
    %250 = vector.broadcast %cst_117 : f32 to vector<8x128xf32>
    %251 = arith.addf %250, %249 : vector<8x128xf32>
    %252 = arith.divf %250, %251 : vector<8x128xf32>
    %253 = vector.extract_strided_slice %246 {offsets = [0, 128], sizes = [8, 128], strides = [1, 1]} : vector<8x512xf32> to vector<8x128xf32>
    %254 = arith.negf %253 : vector<8x128xf32>
    %255 = math.exp %254 : vector<8x128xf32>
    %cst_118 = arith.constant 1.000000e+00 : f32
    %256 = vector.broadcast %cst_118 : f32 to vector<8x128xf32>
    %257 = arith.addf %256, %255 : vector<8x128xf32>
    %258 = arith.divf %256, %257 : vector<8x128xf32>
    %259 = vector.extract_strided_slice %246 {offsets = [0, 256], sizes = [8, 128], strides = [1, 1]} : vector<8x512xf32> to vector<8x128xf32>
    %260 = math.tanh %259 : vector<8x128xf32>
    %261 = vector.extract_strided_slice %246 {offsets = [0, 384], sizes = [8, 128], strides = [1, 1]} : vector<8x512xf32> to vector<8x128xf32>
    %262 = arith.negf %261 : vector<8x128xf32>
    %263 = math.exp %262 : vector<8x128xf32>
    %cst_119 = arith.constant 1.000000e+00 : f32
    %264 = vector.broadcast %cst_119 : f32 to vector<8x128xf32>
    %265 = arith.addf %264, %263 : vector<8x128xf32>
    %266 = arith.divf %264, %265 : vector<8x128xf32>
    %c0_120 = arith.constant 0 : index
    %c0_121 = arith.constant 0 : index
    %267 = vector.load %arg10[%c0_120, %c0_121] : memref<8x128xf32, #tpu.memory_space<vmem>>, vector<8x128xf32>
    %268 = arith.mulf %258, %267 : vector<8x128xf32>
    %269 = arith.mulf %252, %260 : vector<8x128xf32>
    %270 = arith.addf %268, %269 : vector<8x128xf32>
    %271 = math.tanh %270 : vector<8x128xf32>
    %272 = arith.mulf %266, %271 : vector<8x128xf32>
    %c0_122 = arith.constant 0 : index
    %c0_123 = arith.constant 0 : index
    %273 = vector.load %arg10[%c0_122, %c0_123] : memref<8x128xf32, #tpu.memory_space<vmem>>, vector<8x128xf32>
    tpu.vector_store %arg10[%c0_122, %c0_123], %270 {strides = array<i32>} : memref<8x128xf32, #tpu.memory_space<vmem>>, vector<8x128xf32>,
    %c0_124 = arith.constant 0 : index
    %c0_125 = arith.constant 0 : index
    %274 = vector.load %arg9[%c0_124, %c0_125] : memref<8x128xf32, #tpu.memory_space<vmem>>, vector<8x128xf32>
    tpu.vector_store %arg9[%c0_124, %c0_125], %272 {strides = array<i32>} : memref<8x128xf32, #tpu.memory_space<vmem>>, vector<8x128xf32>,
    %275 = arith.index_cast %c6_i32 : i32 to index
    %c0_126 = arith.constant 0 : index
    %c0_127 = arith.constant 0 : index
    %276 = vector.load %arg8[%275, %c0_126, %c0_127] : memref<9x8x128xf32, #tpu.memory_space<vmem>>, vector<1x8x128xf32>
    %277 = vector.shape_cast %276 : vector<1x8x128xf32> to vector<8x128xf32>
    %278 = vector.shape_cast %272 : vector<8x128xf32> to vector<1x8x128xf32>
    tpu.vector_store %arg8[%275, %c0_126, %c0_127], %278 {strides = array<i32>} : memref<9x8x128xf32, #tpu.memory_space<vmem>>, vector<1x8x128xf32>,
    %c7_i32 = arith.constant 7 : i32
    %279 = arith.index_cast %c7_i32 : i32 to index
    %c0_128 = arith.constant 0 : index
    %c0_129 = arith.constant 0 : index
    %280 = vector.load %arg7[%279, %c0_128, %c0_129] : memref<9x8x512xf32, #tpu.memory_space<vmem>>, vector<1x8x512xf32>
    %281 = vector.shape_cast %280 : vector<1x8x512xf32> to vector<8x512xf32>
    %c0_130 = arith.constant 0 : index
    %c0_131 = arith.constant 0 : index
    %282 = vector.load %arg9[%c0_130, %c0_131] : memref<8x128xf32, #tpu.memory_space<vmem>>, vector<8x128xf32>
    %cst_132 = arith.constant dense<0.000000e+00> : vector<8x512xf32>
    %283 = tpu.matmul %282, %12, %cst_132 {dimension_numbers = #tpu.dot_dimension_numbers<[1], [0], [0], [1], [0, 0, 1, 1], [], []>} : vector<8x128xf32>, vector<128x512xf32>, vector<8x512xf32> -> vector<8x512xf32>
    %284 = arith.addf %281, %283 : vector<8x512xf32>
    %285 = vector.extract_strided_slice %284 {offsets = [0, 0], sizes = [8, 128], strides = [1, 1]} : vector<8x512xf32> to vector<8x128xf32>
    %286 = arith.negf %285 : vector<8x128xf32>
    %287 = math.exp %286 : vector<8x128xf32>
    %cst_133 = arith.constant 1.000000e+00 : f32
    %288 = vector.broadcast %cst_133 : f32 to vector<8x128xf32>
    %289 = arith.addf %288, %287 : vector<8x128xf32>
    %290 = arith.divf %288, %289 : vector<8x128xf32>
    %291 = vector.extract_strided_slice %284 {offsets = [0, 128], sizes = [8, 128], strides = [1, 1]} : vector<8x512xf32> to vector<8x128xf32>
    %292 = arith.negf %291 : vector<8x128xf32>
    %293 = math.exp %292 : vector<8x128xf32>
    %cst_134 = arith.constant 1.000000e+00 : f32
    %294 = vector.broadcast %cst_134 : f32 to vector<8x128xf32>
    %295 = arith.addf %294, %293 : vector<8x128xf32>
    %296 = arith.divf %294, %295 : vector<8x128xf32>
    %297 = vector.extract_strided_slice %284 {offsets = [0, 256], sizes = [8, 128], strides = [1, 1]} : vector<8x512xf32> to vector<8x128xf32>
    %298 = math.tanh %297 : vector<8x128xf32>
    %299 = vector.extract_strided_slice %284 {offsets = [0, 384], sizes = [8, 128], strides = [1, 1]} : vector<8x512xf32> to vector<8x128xf32>
    %300 = arith.negf %299 : vector<8x128xf32>
    %301 = math.exp %300 : vector<8x128xf32>
    %cst_135 = arith.constant 1.000000e+00 : f32
    %302 = vector.broadcast %cst_135 : f32 to vector<8x128xf32>
    %303 = arith.addf %302, %301 : vector<8x128xf32>
    %304 = arith.divf %302, %303 : vector<8x128xf32>
    %c0_136 = arith.constant 0 : index
    %c0_137 = arith.constant 0 : index
    %305 = vector.load %arg10[%c0_136, %c0_137] : memref<8x128xf32, #tpu.memory_space<vmem>>, vector<8x128xf32>
    %306 = arith.mulf %296, %305 : vector<8x128xf32>
    %307 = arith.mulf %290, %298 : vector<8x128xf32>
    %308 = arith.addf %306, %307 : vector<8x128xf32>
    %309 = math.tanh %308 : vector<8x128xf32>
    %310 = arith.mulf %304, %309 : vector<8x128xf32>
    %c0_138 = arith.constant 0 : index
    %c0_139 = arith.constant 0 : index
    %311 = vector.load %arg10[%c0_138, %c0_139] : memref<8x128xf32, #tpu.memory_space<vmem>>, vector<8x128xf32>
    tpu.vector_store %arg10[%c0_138, %c0_139], %308 {strides = array<i32>} : memref<8x128xf32, #tpu.memory_space<vmem>>, vector<8x128xf32>,
    %c0_140 = arith.constant 0 : index
    %c0_141 = arith.constant 0 : index
    %312 = vector.load %arg9[%c0_140, %c0_141] : memref<8x128xf32, #tpu.memory_space<vmem>>, vector<8x128xf32>
    tpu.vector_store %arg9[%c0_140, %c0_141], %310 {strides = array<i32>} : memref<8x128xf32, #tpu.memory_space<vmem>>, vector<8x128xf32>,
    %313 = arith.index_cast %c7_i32 : i32 to index
    %c0_142 = arith.constant 0 : index
    %c0_143 = arith.constant 0 : index
    %314 = vector.load %arg8[%313, %c0_142, %c0_143] : memref<9x8x128xf32, #tpu.memory_space<vmem>>, vector<1x8x128xf32>
    %315 = vector.shape_cast %314 : vector<1x8x128xf32> to vector<8x128xf32>
    %316 = vector.shape_cast %310 : vector<8x128xf32> to vector<1x8x128xf32>
    tpu.vector_store %arg8[%313, %c0_142, %c0_143], %316 {strides = array<i32>} : memref<9x8x128xf32, #tpu.memory_space<vmem>>, vector<1x8x128xf32>,
    %c8_i32 = arith.constant 8 : i32
    %317 = arith.index_cast %c8_i32 : i32 to index
    %c0_144 = arith.constant 0 : index
    %c0_145 = arith.constant 0 : index
    %318 = vector.load %arg7[%317, %c0_144, %c0_145] : memref<9x8x512xf32, #tpu.memory_space<vmem>>, vector<1x8x512xf32>
    %319 = vector.shape_cast %318 : vector<1x8x512xf32> to vector<8x512xf32>
    %c0_146 = arith.constant 0 : index
    %c0_147 = arith.constant 0 : index
    %320 = vector.load %arg9[%c0_146, %c0_147] : memref<8x128xf32, #tpu.memory_space<vmem>>, vector<8x128xf32>
    %cst_148 = arith.constant dense<0.000000e+00> : vector<8x512xf32>
    %321 = tpu.matmul %320, %12, %cst_148 {dimension_numbers = #tpu.dot_dimension_numbers<[1], [0], [0], [1], [0, 0, 1, 1], [], []>} : vector<8x128xf32>, vector<128x512xf32>, vector<8x512xf32> -> vector<8x512xf32>
    %322 = arith.addf %319, %321 : vector<8x512xf32>
    %323 = vector.extract_strided_slice %322 {offsets = [0, 0], sizes = [8, 128], strides = [1, 1]} : vector<8x512xf32> to vector<8x128xf32>
    %324 = arith.negf %323 : vector<8x128xf32>
    %325 = math.exp %324 : vector<8x128xf32>
    %cst_149 = arith.constant 1.000000e+00 : f32
    %326 = vector.broadcast %cst_149 : f32 to vector<8x128xf32>
    %327 = arith.addf %326, %325 : vector<8x128xf32>
    %328 = arith.divf %326, %327 : vector<8x128xf32>
    %329 = vector.extract_strided_slice %322 {offsets = [0, 128], sizes = [8, 128], strides = [1, 1]} : vector<8x512xf32> to vector<8x128xf32>
    %330 = arith.negf %329 : vector<8x128xf32>
    %331 = math.exp %330 : vector<8x128xf32>
    %cst_150 = arith.constant 1.000000e+00 : f32
    %332 = vector.broadcast %cst_150 : f32 to vector<8x128xf32>
    %333 = arith.addf %332, %331 : vector<8x128xf32>
    %334 = arith.divf %332, %333 : vector<8x128xf32>
    %335 = vector.extract_strided_slice %322 {offsets = [0, 256], sizes = [8, 128], strides = [1, 1]} : vector<8x512xf32> to vector<8x128xf32>
    %336 = math.tanh %335 : vector<8x128xf32>
    %337 = vector.extract_strided_slice %322 {offsets = [0, 384], sizes = [8, 128], strides = [1, 1]} : vector<8x512xf32> to vector<8x128xf32>
    %338 = arith.negf %337 : vector<8x128xf32>
    %339 = math.exp %338 : vector<8x128xf32>
    %cst_151 = arith.constant 1.000000e+00 : f32
    %340 = vector.broadcast %cst_151 : f32 to vector<8x128xf32>
    %341 = arith.addf %340, %339 : vector<8x128xf32>
    %342 = arith.divf %340, %341 : vector<8x128xf32>
    %c0_152 = arith.constant 0 : index
    %c0_153 = arith.constant 0 : index
    %343 = vector.load %arg10[%c0_152, %c0_153] : memref<8x128xf32, #tpu.memory_space<vmem>>, vector<8x128xf32>
    %344 = arith.mulf %334, %343 : vector<8x128xf32>
    %345 = arith.mulf %328, %336 : vector<8x128xf32>
    %346 = arith.addf %344, %345 : vector<8x128xf32>
    %347 = math.tanh %346 : vector<8x128xf32>
    %348 = arith.mulf %342, %347 : vector<8x128xf32>
    %c0_154 = arith.constant 0 : index
    %c0_155 = arith.constant 0 : index
    %349 = vector.load %arg10[%c0_154, %c0_155] : memref<8x128xf32, #tpu.memory_space<vmem>>, vector<8x128xf32>
    tpu.vector_store %arg10[%c0_154, %c0_155], %346 {strides = array<i32>} : memref<8x128xf32, #tpu.memory_space<vmem>>, vector<8x128xf32>,
    %c0_156 = arith.constant 0 : index
    %c0_157 = arith.constant 0 : index
    %350 = vector.load %arg9[%c0_156, %c0_157] : memref<8x128xf32, #tpu.memory_space<vmem>>, vector<8x128xf32>
    tpu.vector_store %arg9[%c0_156, %c0_157], %348 {strides = array<i32>} : memref<8x128xf32, #tpu.memory_space<vmem>>, vector<8x128xf32>,
    %351 = arith.index_cast %c8_i32 : i32 to index
    %c0_158 = arith.constant 0 : index
    %c0_159 = arith.constant 0 : index
    %352 = vector.load %arg8[%351, %c0_158, %c0_159] : memref<9x8x128xf32, #tpu.memory_space<vmem>>, vector<1x8x128xf32>
    %353 = vector.shape_cast %352 : vector<1x8x128xf32> to vector<8x128xf32>
    %354 = vector.shape_cast %348 : vector<8x128xf32> to vector<1x8x128xf32>
    tpu.vector_store %arg8[%351, %c0_158, %c0_159], %354 {strides = array<i32>} : memref<9x8x128xf32, #tpu.memory_space<vmem>>, vector<1x8x128xf32>,
    %c9_i32 = arith.constant 9 : i32
    %c0_160 = arith.constant 0 : index
    %c0_161 = arith.constant 0 : index
    %c0_162 = arith.constant 0 : index
    %355 = vector.load %arg8[%c0_160, %c0_161, %c0_162] : memref<9x8x128xf32, #tpu.memory_space<vmem>>, vector<9x8x128xf32>
    %356 = vector.shape_cast %355 : vector<9x8x128xf32> to vector<72x128xf32>
    %c0_163 = arith.constant 0 : index
    %c0_164 = arith.constant 0 : index
    %357 = vector.load %arg4[%c0_163, %c0_164] : memref<128x256xf32, #tpu.memory_space<vmem>>, vector<128x256xf32>
    %cst_165 = arith.constant dense<0.000000e+00> : vector<72x256xf32>
    %358 = tpu.matmul %356, %357, %cst_165 {dimension_numbers = #tpu.dot_dimension_numbers<[1], [0], [0], [1], [0, 0, 1, 1], [], []>} : vector<72x128xf32>, vector<128x256xf32>, vector<72x256xf32> -> vector<72x256xf32>
    %c0_166 = arith.constant 0 : index
    %c0_167 = arith.constant 0 : index
    %359 = vector.load %arg5[%c0_166, %c0_167] : memref<1x256xf32, #tpu.memory_space<vmem>>, vector<1x256xf32>
    %360 = vector.broadcast %359 : vector<1x256xf32> to vector<72x256xf32>
    %361 = arith.addf %358, %360 : vector<72x256xf32>
    %c0_168 = arith.constant 0 : index
    %c0_169 = arith.constant 0 : index
    %362 = vector.load %arg6[%c0_168, %c0_169] : memref<72x256xf32, #tpu.memory_space<vmem>>, vector<72x256xf32>
    tpu.vector_store %arg6[%c0_168, %c0_169], %361 {strides = array<i32>} : memref<72x256xf32, #tpu.memory_space<vmem>>, vector<72x256xf32>,
    return
  }
}

</mosaic_0001>

<bundles_post_ra>
// kernel: tpu_custom_call.1
= control target key start
LH: loop header
LB: loop body
LE: loop exit
PB: predicated region body
PF: predicated region fallthrough
CT: control target
= control target key end

     0   :  { %11 = vsyncpa [#allocation7], 0  ;;  %s4064_s0 = inlined_call_operand.hbm [shape: f32[72,128], index: 0, kind: input, shape index: {}]   ;;  %s4065_s1 = inlined_call_operand.hbm [shape: f32[128,512], index: 1, kind: input, shape index: {}]   ;;  %s4066_s2 = inlined_call_operand.hbm [shape: f32[128,512], index: 2, kind: input, shape index: {}]   ;;  %s4067_s3 = inlined_call_operand.vmem [shape: f32[1,512], index: 3, kind: input, shape index: {}]   ;;  %s4068_s4 = inlined_call_operand.hbm [shape: f32[128,256], index: 4, kind: input, shape index: {}]   ;;  %s4069_s5 = inlined_call_operand.vmem [shape: f32[1,256], index: 5, kind: input, shape index: {}]   ;;  %s4070_s6 = inlined_call_operand.hbm [shape: f32[72,256], index: 6, kind: output, shape index: {}]  }
   0x1   :  { %12 = vsyncpa [#allocation10], 0 }
   0x2   :  { %13 = vsyncpa [#allocation13], 0 }
   0x3   :  { %14 = vsyncpa [#allocation8], 0  ;;  %s3395_s21 = smov [#allocation9]   ;;  %s3277_s25 = scalar_lea.hbm %s4065_s1, 8192 }
   0x4   :  { %s32_s22 = sshll.u32 %s3395_s21, 4  ;;  %p3278_p0 = scmp.ne.s32.totalorder %s4065_s1, %s3277_s25  ;;  %s33_s22 = int_to_ptr.vmem [resolvable:$true] %s32_s22 }
   0x5   :  { %p3281_p1 = scmp.lt.u32.totalorder %s3277_s25, %s4065_s1 }
   0x7   :  { %p3283_p2 = pnand %p3281_p1, %p3278_p0 }
   0x9   :  { %3286 = shalt.err (!%p3283_p2)
}
   0xa   :  { %s3287_s30 = scalar_lea.vmem %s33_s22, 8192  ;;  %p3292_p4 = scmp.lt.s32.totalorder %s33_s22, %s33_s22 }
   0xb   :  { %p3288_p3 = scmp.ne.s32.totalorder %s33_s22, %s3287_s30  ;;  %p3293_p5 = scmp.lt.s32.totalorder %s3287_s30, %s3287_s30 }
   0xd   :  { %p3294_p6 = por %p3293_p5, %p3292_p4 }
   0xf   :  { %p3295_p7 = pnand %p3294_p6, %p3288_p3 }
  0x11   :  { %3298 = shalt.err (!%p3295_p7)
}
  0x12   :  { %s3396_s7 = smov 512   ;;  %s3397_s8 = smov 32  }
  0x13   :  { %38 = dma.hbm_to_vmem [thread:$0]  %s4065_s1, 8192, %s33_s22, [#allocation10], %s3396_s7, %s3396_s7, %s3397_s8  }
  0x14   :  { %s3398_s11 = smov [#allocation6]   ;;  %s3299_s15 = scalar_lea.hbm %s4064_s0, 1152 }
  0x15   :  { %s20_s12 = sshll.u32 %s3398_s11, 4  ;;  %p3300_p8 = scmp.ne.s32.totalorder %s4064_s0, %s3299_s15  ;;  %s21_s12 = int_to_ptr.vmem [resolvable:$true] %s20_s12 }
  0x16   :  { %p3303_p9 = scmp.lt.u32.totalorder %s3299_s15, %s4064_s0 }
  0x18   :  { %p3305_p10 = pnand %p3303_p9, %p3300_p8 }
  0x1a   :  { %3308 = shalt.err (!%p3305_p10)
}
  0x1b   :  { %s3309_s20 = scalar_lea.vmem %s21_s12, 1152  ;;  %p3314_p12 = scmp.lt.s32.totalorder %s21_s12, %s21_s12 }
  0x1c   :  { %p3310_p11 = scmp.ne.s32.totalorder %s21_s12, %s3309_s20  ;;  %p3315_p13 = scmp.lt.s32.totalorder %s3309_s20, %s3309_s20 }
  0x1e   :  { %p3316_p0 = por %p3315_p13, %p3314_p12 }
  0x20   :  { %p3317_p1 = pnand %p3316_p0, %p3310_p11 }
  0x22   :  { %3320 = shalt.err (!%p3317_p1)
}
  0x23   :  { %s3399_s1 = smov 128   ;;  %s3400_s21 = smov 8  }
  0x24   :  { %26 = dma.hbm_to_vmem [thread:$0]  %s4064_s0, 1152, %s21_s12, [#allocation7], %s3399_s1, %s3399_s1, %s3400_s21  }
  0x25   :  { %s3401_s24 = smov [#allocation11]   ;;  %s3402_s26 = smov [#allocation12]  }
  0x26   :  { %s44_s25 = sshll.u32 %s3401_s24, 4  ;;  %s58_s27 = sshll.u32 %s3402_s26, 4  ;;  %s45_s25 = int_to_ptr.vmem [resolvable:$true] %s44_s25  ;;  %s3469_s27 = int_to_ptr.vmem [resolvable:$true] %s58_s27 }
  0x27   :  { %s3321_s30 = scalar_lea.hbm %s4066_s2, 8192 }
  0x28   :  { %p3322_p2 = scmp.ne.s32.totalorder %s4066_s2, %s3321_s30  ;;  %p3325_p3 = scmp.lt.u32.totalorder %s3321_s30, %s4066_s2 }
  0x2a   :  { %p3327_p4 = pnand %p3325_p3, %p3322_p2 }
  0x2c   :  { %3330 = shalt.err (!%p3327_p4)
}
  0x2d   :  { %s3331_s0 = scalar_lea.vmem %s45_s25, 8192  ;;  %p3336_p6 = scmp.lt.s32.totalorder %s45_s25, %s45_s25 }
  0x2e   :  { %p3332_p5 = scmp.ne.s32.totalorder %s45_s25, %s3331_s0  ;;  %p3337_p7 = scmp.lt.s32.totalorder %s3331_s0, %s3331_s0 }
  0x30   :  { %p3338_p8 = por %p3337_p7, %p3336_p6 }
  0x32   :  { %p3339_p9 = pnand %p3338_p8, %p3332_p5 }
  0x34   :  { %3342 = shalt.err (!%p3339_p9)
}
  0x35   :  { %50 = dma.hbm_to_vmem [thread:$0]  %s4066_s2, 8192, %s45_s25, [#allocation10], %s3396_s7, %s3396_s7, %s3397_s8  }
  0x36   :  { %s3343_s17 = scalar_lea.hbm %s4068_s4, 4096 }
  0x37   :  { %p3344_p10 = scmp.ne.s32.totalorder %s4068_s4, %s3343_s17  ;;  %p3347_p11 = scmp.lt.u32.totalorder %s3343_s17, %s4068_s4 }
  0x39   :  { %p3349_p12 = pnand %p3347_p11, %p3344_p10 }
  0x3b   :  { %3352 = shalt.err (!%p3349_p12)
}
  0x3c   :  { %s3353_s21 = scalar_lea.vmem %s3469_s27, 4096  ;;  %p3358_p0 = scmp.lt.s32.totalorder %s3469_s27, %s3469_s27 }
  0x3d   :  { %p3354_p13 = scmp.ne.s32.totalorder %s3469_s27, %s3353_s21  ;;  %p3359_p1 = scmp.lt.s32.totalorder %s3353_s21, %s3353_s21 }
  0x3f   :  { %p3360_p2 = por %p3359_p1, %p3358_p0 }
  0x41   :  { %p3361_p3 = pnand %p3360_p2, %p3354_p13 }
  0x43   :  { %3364 = shalt.err (!%p3361_p3)
}
  0x44   :  { %s3403_s2 = smov 256   ;;  %s3404_s7 = smov 16  }
  0x45   :  { %64 = dma.hbm_to_vmem [thread:$0]  %s4068_s4, 4096, %s3469_s27, [#allocation13], %s3403_s2, %s3403_s2, %s3404_s7  }
  0x46   :  { %3387 = dma.done.wait [#allocation7], 1152  }
  0x47   :  { %3388 = vsyncadd [#allocation7], 4294966144 }
  0x48   :  { %3389 = dma.done.wait [#allocation10], 16384  }
  0x49   :  { %3390 = vsyncadd [#allocation10], 4294950912 }
  0x4a   :  { %3391 = dma.done.wait [#allocation13], 4096  }
  0x4b   :  { %3392 = vsyncadd [#allocation13], 4294963200  ;;  %v3405_v0 = vmov 0.0   ;;  %v91_v1 = vld [vmem:[#allocation9 + $0x18] sm:$0xff]  ;;  %v90_v3 = vld [vmem:[#allocation9 + $0x10] sm:$0xff] }
  0x4c   :  { %357 = vmatprep.mubr.f32.mxu1 %v3405_v0  ;;  %238 = vmatprep.mubr.f32.mxu0 %v3405_v0  ;;  %v95_v2 = vld [vmem:[#allocation9 + $0x38] sm:$0xff]  ;;  %v94_v5 = vld [vmem:[#allocation9 + $0x30] sm:$0xff]  ;;  %v89_v28 = vld [vmem:[#allocation9 + $0x8] sm:$0xff] }
  0x4d   :  { %v2409_v4 = vpack.c.bf16 %v95_v2, %v91_v1  ;;  %v99_v6 = vld [vmem:[#allocation9 + $0x58] sm:$0xff]  ;;  %v2411_v8 = vpack.c.bf16 %v94_v5, %v90_v3  ;;  %v98_v10 = vld [vmem:[#allocation9 + $0x50] sm:$0xff]  ;;  %v93_v29 = vld [vmem:[#allocation9 + $0x28] sm:$0xff] }
  0x4e   :  { %v103_v7 = vld [vmem:[#allocation9 + $0x78] sm:$0xff]  ;;  %v102_v11 = vld [vmem:[#allocation9 + $0x70] sm:$0xff]  ;;  %v2377_v32 = vpack.c.bf16 %v93_v29, %v89_v28  ;;  %v88_v33 = vld [vmem:[#allocation9] sm:$0xff] }
  0x4f   :  { %v2413_v9 = vpack.c.bf16 %v103_v7, %v99_v6  ;;  %v107_v12 = vld [vmem:[#allocation9 + $0x98] sm:$0xff]  ;;  %2410 = vmatprep.subr.bf16.mxu1 %v2409_v4  ;;  %v2415_v14 = vpack.c.bf16 %v102_v11, %v98_v10  ;;  %v106_v16 = vld [vmem:[#allocation9 + $0x90] sm:$0xff]  ;;  %v92_v34 = vld [vmem:[#allocation9 + $0x20] sm:$0xff] }
  0x50   :  { %v111_v13 = vld [vmem:[#allocation9 + $0xb8] sm:$0xff]  ;;  %2412 = vmatpush1.bf16.msra.mxu1 %v2411_v8  ;;  %v110_v17 = vld [vmem:[#allocation9 + $0xb0] sm:$0xff]  ;;  %v2379_v37 = vpack.c.bf16 %v92_v34, %v88_v33  ;;  %v97_v38 = vld [vmem:[#allocation9 + $0x48] sm:$0xff]  ;;  %2378 = vmatprep.subr.bf16.mxu0 %v2377_v32 }
  0x51   :  { %2414 = vmatprep.subr.bf16.mxu1 %v2413_v9  ;;  %v2417_v15 = vpack.c.bf16 %v111_v13, %v107_v12  ;;  %v115_v18 = vld [vmem:[#allocation9 + $0xd8] sm:$0xff]  ;;  %v2419_v20 = vpack.c.bf16 %v110_v17, %v106_v16  ;;  %v114_v22 = vld [vmem:[#allocation9 + $0xd0] sm:$0xff]  ;;  %v101_v39 = vld [vmem:[#allocation9 + $0x68] sm:$0xff] }
  0x52   :  { %v119_v19 = vld [vmem:[#allocation9 + $0xf8] sm:$0xff]  ;;  %v118_v23 = vld [vmem:[#allocation9 + $0xf0] sm:$0xff]  ;;  %2380 = vmatpush1.bf16.msra.mxu0 %v2379_v37  ;;  %v2381_v41 = vpack.c.bf16 %v101_v39, %v97_v38  ;;  %v96_v42 = vld [vmem:[#allocation9 + $0x40] sm:$0xff] }
  0x53   :  { %v2421_v21 = vpack.c.bf16 %v119_v19, %v115_v18  ;;  %v123_v24 = vld [vmem:[#allocation9 + $0x118] sm:$0xff]  ;;  %v2423_v26 = vpack.c.bf16 %v118_v23, %v114_v22  ;;  %v122_v27 = vld [vmem:[#allocation9 + $0x110] sm:$0xff]  ;;  %v100_v43 = vld [vmem:[#allocation9 + $0x60] sm:$0xff] }
  0x54   :  { %2416 = vmatpush1.bf16.msra.mxu1 %v2415_v14  ;;  %v127_v25 = vld [vmem:[#allocation9 + $0x138] sm:$0xff]  ;;  %v126_v31 = vld [vmem:[#allocation9 + $0x130] sm:$0xff]  ;;  %v2383_v47 = vpack.c.bf16 %v100_v43, %v96_v42  ;;  %v105_v48 = vld [vmem:[#allocation9 + $0x88] sm:$0xff]  ;;  %2382 = vmatprep.subr.bf16.mxu0 %v2381_v41 }
  0x55   :  { %2418 = vmatprep.subr.bf16.mxu1 %v2417_v15  ;;  %v2425_v30 = vpack.c.bf16 %v127_v25, %v123_v24  ;;  %v131_v35 = vld [vmem:[#allocation9 + $0x158] sm:$0xff]  ;;  %v2427_v40 = vpack.c.bf16 %v126_v31, %v122_v27  ;;  %v130_v45 = vld [vmem:[#allocation9 + $0x150] sm:$0xff]  ;;  %v109_v51 = vld [vmem:[#allocation9 + $0xa8] sm:$0xff] }
  0x56   :  { %v135_v36 = vld [vmem:[#allocation9 + $0x178] sm:$0xff]  ;;  %v134_v46 = vld [vmem:[#allocation9 + $0x170] sm:$0xff]  ;;  %v2385_v52 = vpack.c.bf16 %v109_v51, %v105_v48  ;;  %v104_v53 = vld [vmem:[#allocation9 + $0x80] sm:$0xff]  ;;  %2384 = vmatpush1.bf16.msra.mxu0 %v2383_v47 }
  0x57   :  { %v2429_v44 = vpack.c.bf16 %v135_v36, %v131_v35  ;;  %v139_v49 = vld [vmem:[#allocation9 + $0x198] sm:$0xff]  ;;  %v108_v54 = vld [vmem:[#allocation9 + $0xa0] sm:$0xff]  ;;  %v2431_v55 = vpack.c.bf16 %v134_v46, %v130_v45  ;;  %v138_v56 = vld [vmem:[#allocation9 + $0x190] sm:$0xff] }
  0x58   :  { %2420 = vmatpush1.bf16.msra.mxu1 %v2419_v20  ;;  %v143_v50 = vld [vmem:[#allocation9 + $0x1b8] sm:$0xff]  ;;  %v2387_v57 = vpack.c.bf16 %v108_v54, %v104_v53  ;;  %v113_v58 = vld [vmem:[#allocation9 + $0xc8] sm:$0xff]  ;;  %v142_v61 = vld [vmem:[#allocation9 + $0x1b0] sm:$0xff]  ;;  %2386 = vmatprep.subr.bf16.mxu0 %v2385_v52 }
  0x59   :  { %2422 = vmatprep.subr.bf16.mxu1 %v2421_v21  ;;  %v117_v59 = vld [vmem:[#allocation9 + $0xe8] sm:$0xff]  ;;  %v2433_v60 = vpack.c.bf16 %v143_v50, %v139_v49  ;;  %v112_v63 = vld [vmem:[#allocation9 + $0xc0] sm:$0xff]  ;;  %v147_v2 = vld [vmem:[#allocation9 + $0x1d8] sm:$0xff]  ;;  %v2435_v6 = vpack.c.bf16 %v142_v61, %v138_v56 }
  0x5a   :  { %v2389_v62 = vpack.c.bf16 %v117_v59, %v113_v58  ;;  %v116_v1 = vld [vmem:[#allocation9 + $0xe0] sm:$0xff]  ;;  %v151_v3 = vld [vmem:[#allocation9 + $0x1f8] sm:$0xff]  ;;  %v121_v4 = vld [vmem:[#allocation9 + $0x108] sm:$0xff]  ;;  %2388 = vmatpush1.bf16.msra.mxu0 %v2387_v57 }
  0x5b   :  { %v125_v5 = vld [vmem:[#allocation9 + $0x128] sm:$0xff]  ;;  %v146_v7 = vld [vmem:[#allocation9 + $0x1d0] sm:$0xff]  ;;  %v2391_v9 = vpack.c.bf16 %v116_v1, %v112_v63  ;;  %v2437_v10 = vpack.c.bf16 %v151_v3, %v147_v2  ;;  %v120_v13 = vld [vmem:[#allocation9 + $0x100] sm:$0xff] }
  0x5c   :  { %2424 = vmatpush1.bf16.msra.mxu1 %v2423_v26  ;;  %v150_v8 = vld [vmem:[#allocation9 + $0x1f0] sm:$0xff]  ;;  %v451_v11 = vld [vmem:[#allocation11 + $0x8] sm:$0xff]  ;;  %2390 = vmatprep.subr.bf16.mxu0 %v2389_v62  ;;  %v2393_v12 = vpack.c.bf16 %v125_v5, %v121_v4  ;;  %v124_v14 = vld [vmem:[#allocation9 + $0x120] sm:$0xff] }
  0x5d   :  { %2426 = vmatprep.subr.bf16.mxu1 %v2425_v30  ;;  %v455_v15 = vld [vmem:[#allocation11 + $0x28] sm:$0xff]  ;;  %v2439_v18 = vpack.c.bf16 %v150_v8, %v146_v7  ;;  %v2395_v19 = vpack.c.bf16 %v124_v14, %v120_v13  ;;  %v450_v21 = vld [vmem:[#allocation11] sm:$0xff]  ;;  %v3510_v30 = vld [vmem:[#allocation6] sm:$0xff] }
  0x5e   :  { %v129_v16 = vld [vmem:[#allocation9 + $0x148] sm:$0xff]  ;;  %2392 = vmatpush1.bf16.msra.mxu0 %v2391_v9  ;;  %v3508_v20 = vpack.c.bf16 %v455_v15, %v451_v11  ;;  %v454_v22 = vld [vmem:[#allocation11 + $0x20] sm:$0xff]  ;;  %v82_v62 = vld [vmem:[#allocation6 + $0x18] sm:$0xff] }
  0x5f   :  { %v133_v17 = vld [vmem:[#allocation9 + $0x168] sm:$0xff]  ;;  %2394 = vmatprep.subr.bf16.mxu0 %v2393_v12  ;;  %v128_v26 = vld [vmem:[#allocation9 + $0x140] sm:$0xff]  ;;  %v3512_v31 = vpack.c.bf16 %v454_v22, %v450_v21 }
  0x60   :  { %2428 = vmatpush1.bf16.msra.mxu1 %v2427_v40  ;;  %v459_v23 = vld [vmem:[#allocation11 + $0x48] sm:$0xff]  ;;  %v2397_v24 = vpack.c.bf16 %v133_v17, %v129_v16  ;;  %v132_v27 = vld [vmem:[#allocation9 + $0x160] sm:$0xff] }
  0x61   :  { %2430 = vmatprep.subr.bf16.mxu1 %v2429_v44  ;;  %v463_v25 = vld [vmem:[#allocation11 + $0x68] sm:$0xff]  ;;  %v458_v33 = vld [vmem:[#allocation11 + $0x40] sm:$0xff]  ;;  %v2399_v36 = vpack.c.bf16 %v132_v27, %v128_v26  ;;  %v453_v26 = vld [vmem:[#allocation11 + $0x18] sm:$0xff] }
  0x62   :  { %v137_v28 = vld [vmem:[#allocation9 + $0x188] sm:$0xff]  ;;  %2396 = vmatpush1.bf16.msra.mxu0 %v2395_v19  ;;  %v3515_v32 = vpack.c.bf16 %v463_v25, %v459_v23  ;;  %v462_v34 = vld [vmem:[#allocation11 + $0x60] sm:$0xff]  ;;  %v457_v27 = vld [vmem:[#allocation11 + $0x38] sm:$0xff] }
  0x63   :  { %v141_v29 = vld [vmem:[#allocation9 + $0x1a8] sm:$0xff]  ;;  %2398 = vmatprep.subr.bf16.mxu0 %v2397_v24  ;;  %v136_v39 = vld [vmem:[#allocation9 + $0x180] sm:$0xff]  ;;  %v3522_v44 = vpack.c.bf16 %v462_v34, %v458_v33  ;;  %v87_v33 = vld [vmem:[#allocation6 + $0x40] sm:$0xff] }
  0x64   :  { %2432 = vmatpush1.bf16.msra.mxu1 %v2431_v55  ;;  %v467_v35 = vld [vmem:[#allocation11 + $0x88] sm:$0xff]  ;;  %v2401_v38 = vpack.c.bf16 %v141_v29, %v137_v28  ;;  %v140_v40 = vld [vmem:[#allocation9 + $0x1a0] sm:$0xff]  ;;  %v86_v28 = vld [vmem:[#allocation6 + $0x38] sm:$0xff] }
  0x65   :  { %2434 = vmatprep.subr.bf16.mxu1 %v2433_v60  ;;  %v471_v37 = vld [vmem:[#allocation11 + $0xa8] sm:$0xff]  ;;  %v3520_v43 = vld [vmem:[#allocation6 + $0x8] sm:$0xff]  ;;  %v2403_v49 = vpack.c.bf16 %v140_v40, %v136_v39  ;;  %v452_v34 = vld [vmem:[#allocation11 + $0x10] sm:$0xff] }
  0x66   :  { %v145_v41 = vld [vmem:[#allocation9 + $0x1c8] sm:$0xff]  ;;  %v3525_v45 = vpack.c.bf16 %v471_v37, %v467_v35  ;;  %v466_v46 = vld [vmem:[#allocation11 + $0x80] sm:$0xff]  ;;  %2400 = vmatpush1.bf16.msra.mxu0 %v2399_v36  ;;  %v456_v35 = vld [vmem:[#allocation11 + $0x30] sm:$0xff] }
  0x67   :  { %v149_v42 = vld [vmem:[#allocation9 + $0x1e8] sm:$0xff]  ;;  %v470_v47 = vld [vmem:[#allocation11 + $0xa0] sm:$0xff]  ;;  %2402 = vmatprep.subr.bf16.mxu0 %v2401_v38  ;;  %v461_v36 = vld [vmem:[#allocation11 + $0x58] sm:$0xff]  ;;  %v3592_v38 = vpack.c.bf16 %v456_v35, %v452_v34  ;;  %v154_v35 = vlaneseq }
  0x68   :  { %2436 = vmatpush1.bf16.msra.mxu1 %v2435_v6  ;;  %v475_v48 = vld [vmem:[#allocation11 + $0xc8] sm:$0xff]  ;;  %v2405_v51 = vpack.c.bf16 %v149_v42, %v145_v41  ;;  %v144_v52 = vld [vmem:[#allocation9 + $0x1c0] sm:$0xff]  ;;  %v3530_v55 = vpack.c.bf16 %v470_v47, %v466_v46  ;;  %v83_v6 = vld [vmem:[#allocation6 + $0x20] sm:$0xff] }
  0x69   :  { %2438 = vmatprep.subr.bf16.mxu1 %v2437_v10  ;;  %v479_v50 = vld [vmem:[#allocation11 + $0xe8] sm:$0xff]  ;;  %v148_v53 = vld [vmem:[#allocation9 + $0x1e0] sm:$0xff]  ;;  %v465_v37 = vld [vmem:[#allocation11 + $0x78] sm:$0xff] }
  0x6a   :  { %v81_v54 = vld [vmem:[#allocation6 + $0x10] sm:$0xff]  ;;  %v3533_v56 = vpack.c.bf16 %v479_v50, %v475_v48  ;;  %v474_v57 = vld [vmem:[#allocation11 + $0xc0] sm:$0xff]  ;;  %2404 = vmatpush1.bf16.msra.mxu0 %v2403_v49  ;;  %v2407_v59 = vpack.c.bf16 %v148_v53, %v144_v52  ;;  %v3594_v39 = vpack.c.bf16 %v465_v37, %v461_v36  ;;  %v460_v40 = vld [vmem:[#allocation11 + $0x50] sm:$0xff]  ;;  %v3668_v36 = vshrl.u32 %v154_v35, 7 }
  0x6b   :  { %v478_v58 = vld [vmem:[#allocation11 + $0xe0] sm:$0xff]  ;;  %v483_v60 = vld [vmem:[#allocation11 + $0x108] sm:$0xff]  ;;  %2406 = vmatprep.subr.bf16.mxu0 %v2405_v51  ;;  %v464_v41 = vld [vmem:[#allocation11 + $0x70] sm:$0xff] }
  0x6c   :  { %2440 = vmatpush1.bf16.msra.mxu1 %v2439_v18  ;;  %v487_v61 = vld [vmem:[#allocation11 + $0x128] sm:$0xff]  ;;  %v3537_v63 = vpack.c.bf16 %v478_v58, %v474_v57  ;;  %v482_v2 = vld [vmem:[#allocation11 + $0x100] sm:$0xff]  ;;  %v469_v42 = vld [vmem:[#allocation11 + $0x98] sm:$0xff]  ;;  %v3601_v46 = vpack.c.bf16 %v464_v41, %v460_v40  ;;  %v156_v37 = vsub.s32 0, %v3668_v36  ;;  %v160_v41 = vsub.s32 1, %v3668_v36 }
  0x6d   :  { %2442 = vmatprep.subr.bf16.mxu1 %v3508_v20  ;;  %v3540_v1 = vpack.c.bf16 %v487_v61, %v483_v60  ;;  %v486_v3 = vld [vmem:[#allocation11 + $0x120] sm:$0xff]  ;;  %v491_v4 = vld [vmem:[#allocation11 + $0x148] sm:$0xff]  ;;  %v468_v48 = vld [vmem:[#allocation11 + $0x90] sm:$0xff] }
  0x6e   :  { %2408 = vmatpush1.bf16.msra.mxu0 %v2407_v59  ;;  %v495_v5 = vld [vmem:[#allocation11 + $0x168] sm:$0xff]  ;;  %v3545_v7 = vpack.c.bf16 %v486_v3, %v482_v2  ;;  %v490_v9 = vld [vmem:[#allocation11 + $0x140] sm:$0xff]  ;;  %v472_v49 = vld [vmem:[#allocation11 + $0xb0] sm:$0xff] }
  0x6f   :  { %358 = vmatmul.mubr.f32.vlgmr.msra.gmra.mrb[0].mxu1 %v3510_v30  ;;  %2506 = vmatprep.subr.bf16.mxu0 %v3508_v20  ;;  %v3548_v8 = vpack.c.bf16 %v495_v5, %v491_v4  ;;  %v494_v10 = vld [vmem:[#allocation11 + $0x160] sm:$0xff]  ;;  %v499_v11 = vld [vmem:[#allocation11 + $0x188] sm:$0xff]  ;;  %v477_v50 = vld [vmem:[#allocation11 + $0xd8] sm:$0xff]  ;;  %v3611_v52 = vpack.c.bf16 %v472_v49, %v468_v48 }
  0x70   :  { %2444 = vmatpush1.bf16.msra.mxu1 %v3512_v31  ;;  %363 = vmatprep.mubr.f32.mxu1 %v3405_v0  ;;  %v503_v12 = vld [vmem:[#allocation11 + $0x1a8] sm:$0xff]  ;;  %v84_v13 = vld [vmem:[#allocation6 + $0x28] sm:$0xff]  ;;  %v3556_v14 = vpack.c.bf16 %v494_v10, %v490_v9  ;;  %v481_v51 = vld [vmem:[#allocation11 + $0xf8] sm:$0xff] }
  0x71   :  { %2446 = vmatprep.subr.bf16.mxu1 %v3515_v32  ;;  %239 = vmatmul.mubr.f32.vlgmr.msra.gmra.mrb[0].mxu0 %v3510_v30  ;;  %v3559_v15 = vpack.c.bf16 %v503_v12, %v499_v11  ;;  %v498_v16 = vld [vmem:[#allocation11 + $0x180] sm:$0xff]  ;;  %v507_v18 = vld [vmem:[#allocation11 + $0x1c8] sm:$0xff]  ;;  %v3580_v30 = vpack.c.bf16 %v457_v27, %v453_v26  ;;  %v3614_v53 = vpack.c.bf16 %v481_v51, %v477_v50  ;;  %v480_v57 = vld [vmem:[#allocation11 + $0xf0] sm:$0xff] }
  0x72   :  { %2508 = vmatpush1.bf16.msra.mxu0 %v3512_v31  ;;  %244 = vmatprep.mubr.f32.mxu0 %v3405_v0  ;;  %v502_v17 = vld [vmem:[#allocation11 + $0x1a0] sm:$0xff]  ;;  %v511_v19 = vld [vmem:[#allocation11 + $0x1e8] sm:$0xff]  ;;  %v485_v58 = vld [vmem:[#allocation11 + $0x118] sm:$0xff] }
  0x73   :  { %364 = vmatmul.mubr.f32.gmra.mrb[2].mxu1 %v3520_v43  ;;  %2510 = vmatprep.subr.bf16.mxu0 %v3515_v32  ;;  %v85_v21 = vld [vmem:[#allocation6 + $0x30] sm:$0xff]  ;;  %v3567_v22 = vpack.c.bf16 %v502_v17, %v498_v16  ;;  %v3570_v23 = vpack.c.bf16 %v511_v19, %v507_v18  ;;  %v506_v24 = vld [vmem:[#allocation11 + $0x1c0] sm:$0xff]  ;;  %v489_v59 = vld [vmem:[#allocation11 + $0x138] sm:$0xff] }
  0x74   :  { %2448 = vmatpush1.bf16.msra.mxu1 %v3522_v44  ;;  %369 = vmatprep.mubr.f32.mxu1 %v3405_v0  ;;  %v510_v25 = vld [vmem:[#allocation11 + $0x1e0] sm:$0xff]  ;;  %v3623_v61 = vpack.c.bf16 %v489_v59, %v485_v58  ;;  %v488_v2 = vld [vmem:[#allocation11 + $0x130] sm:$0xff]  ;;  %v493_v3 = vld [vmem:[#allocation11 + $0x158] sm:$0xff] }
  0x75   :  { %2450 = vmatprep.subr.bf16.mxu1 %v3525_v45  ;;  %245 = vmatmul.mubr.f32.gmra.mrb[2].mxu0 %v3520_v43  ;;  %v3577_v29 = vpack.c.bf16 %v510_v25, %v506_v24  ;;  %v473_v43 = vld [vmem:[#allocation11 + $0xb8] sm:$0xff]  ;;  %v492_v9 = vld [vmem:[#allocation11 + $0x150] sm:$0xff] }
  0x76   :  { %2512 = vmatpush1.bf16.msra.mxu0 %v3522_v44  ;;  %250 = vmatprep.mubr.f32.mxu0 %v3405_v0  ;;  %v3605_v47 = vpack.c.bf16 %v473_v43, %v469_v42  ;;  %v497_v4 = vld [vmem:[#allocation11 + $0x178] sm:$0xff]  ;;  %v496_v10 = vld [vmem:[#allocation11 + $0x170] sm:$0xff] }
  0x77   :  { %370 = vmatmul.mubr.f32.gmra.mrb[4].mxu1 %v81_v54  ;;  %2514 = vmatprep.subr.bf16.mxu0 %v3525_v45  ;;  %v501_v11 = vld [vmem:[#allocation11 + $0x198] sm:$0xff]  ;;  %v500_v17 = vld [vmem:[#allocation11 + $0x190] sm:$0xff] }
  0x78   :  { %2452 = vmatpush1.bf16.msra.mxu1 %v3530_v55  ;;  %375 = vmatprep.mubr.f32.mxu1 %v3405_v0  ;;  %v505_v12 = vld [vmem:[#allocation11 + $0x1b8] sm:$0xff]  ;;  %v504_v18 = vld [vmem:[#allocation11 + $0x1b0] sm:$0xff] }
  0x79   :  { %2454 = vmatprep.subr.bf16.mxu1 %v3533_v56  ;;  %251 = vmatmul.mubr.f32.gmra.mrb[4].mxu0 %v81_v54  ;;  %v476_v54 = vld [vmem:[#allocation11 + $0xd0] sm:$0xff]  ;;  %v3636_v16 = vpack.c.bf16 %v505_v12, %v501_v11  ;;  %v509_v19 = vld [vmem:[#allocation11 + $0x1d8] sm:$0xff]  ;;  %v3639_v24 = vpack.c.bf16 %v504_v18, %v500_v17 }
  0x7a   :  { %2516 = vmatpush1.bf16.msra.mxu0 %v3530_v55  ;;  %256 = vmatprep.mubr.f32.mxu0 %v3405_v0  ;;  %v3620_v60 = vpack.c.bf16 %v480_v57, %v476_v54  ;;  %v508_v26 = vld [vmem:[#allocation11 + $0x1d0] sm:$0xff]  ;;  %v152_v40 = vld [vmem:[%s4067_s3] sm:$0xf] }
  0x7b   :  { %376 = vmatmul.mubr.f32.gmra.mrb[6].mxu1 %v82_v62  ;;  %2518 = vmatprep.subr.bf16.mxu0 %v3533_v56  ;;  %v512_v27 = vld [vmem:[#allocation11 + $0x1f0] sm:$0xff]  ;;  %v3677_v42 = vrot.slane %v152_v40, %v156_v37  ;;  %v3681_v43 = vrot.slane %v152_v40, %v160_v41 }
  0x7c   :  { %381 = vmatprep.mubr.f32.mxu1 %v3405_v0  ;;  %2456 = vmatpush1.bf16.msra.mxu1 %v3537_v63 }
  0x7d   :  { %2458 = vmatprep.subr.bf16.mxu1 %v3540_v1  ;;  %257 = vmatmul.mubr.f32.gmra.mrb[6].mxu0 %v82_v62  ;;  %v484_v62 = vld [vmem:[#allocation11 + $0x110] sm:$0xff] }
  0x7e   :  { %262 = vmatprep.mubr.f32.mxu0 %v3405_v0  ;;  %2520 = vmatpush1.bf16.msra.mxu0 %v3537_v63  ;;  %v3627_v5 = vpack.c.bf16 %v488_v2, %v484_v62  ;;  %v164_v62 = vsub.s32 2, %v3668_v36 }
  0x7f   :  { %382 = vmatmul.mubr.f32.gmra.mrb[8].mxu1 %v83_v6  ;;  %2522 = vmatprep.subr.bf16.mxu0 %v3540_v1 }
  0x80   :  { %387 = vmatprep.mubr.f32.mxu1 %v3405_v0  ;;  %2460 = vmatpush1.bf16.msra.mxu1 %v3545_v7 }
  0x81   :  { %2462 = vmatprep.subr.bf16.mxu1 %v3548_v8  ;;  %263 = vmatmul.mubr.f32.gmra.mrb[8].mxu0 %v83_v6  ;;  %v3630_v6 = vpack.c.bf16 %v497_v4, %v493_v3  ;;  %v168_v3 = vsub.s32 3, %v3668_v36 }
  0x82   :  { %268 = vmatprep.mubr.f32.mxu0 %v3405_v0  ;;  %2524 = vmatpush1.bf16.msra.mxu0 %v3545_v7 }
  0x83   :  { %388 = vmatmul.mubr.f32.gmra.mrb[10].mxu1 %v84_v13  ;;  %2526 = vmatprep.subr.bf16.mxu0 %v3548_v8  ;;  %v3689_v12 = vrot.slane %v152_v40, %v168_v3 }
  0x84   :  { %393 = vmatprep.mubr.f32.mxu1 %v3405_v0  ;;  %2464 = vmatpush1.bf16.msra.mxu1 %v3556_v14 }
  0x85   :  { %2466 = vmatprep.subr.bf16.mxu1 %v3559_v15  ;;  %269 = vmatmul.mubr.f32.gmra.mrb[10].mxu0 %v84_v13  ;;  %v3633_v13 = vpack.c.bf16 %v496_v10, %v492_v9  ;;  %v3687_v10 = vrot.slane %v152_v40, %v164_v62 }
  0x86   :  { %274 = vmatprep.mubr.f32.mxu0 %v3405_v0  ;;  %2528 = vmatpush1.bf16.msra.mxu0 %v3556_v14 }
  0x87   :  { %394 = vmatmul.mubr.f32.gmra.mrb[12].mxu1 %v85_v21  ;;  %2530 = vmatprep.subr.bf16.mxu0 %v3559_v15 }
  0x88   :  { %399 = vmatprep.mubr.f32.mxu1 %v3405_v0  ;;  %2468 = vmatpush1.bf16.msra.mxu1 %v3567_v22 }
  0x89   :  { %2470 = vmatprep.subr.bf16.mxu1 %v3570_v23  ;;  %275 = vmatmul.mubr.f32.gmra.mrb[12].mxu0 %v85_v21  ;;  %v513_v21 = vld [vmem:[#allocation11 + $0x1f8] sm:$0xff] }
  0x8a   :  { %280 = vmatprep.mubr.f32.mxu0 %v3405_v0  ;;  %2532 = vmatpush1.bf16.msra.mxu0 %v3567_v22  ;;  %v3642_v25 = vpack.c.bf16 %v513_v21, %v509_v19 }
  0x8b   :  { %400 = vmatmul.mubr.f32.gmra.mrb[14].mxu1 %v86_v28  ;;  %2534 = vmatprep.subr.bf16.mxu0 %v3570_v23 }
  0x8c   :  { %405 = vmatprep.mubr.f32.mxu1 %v3405_v0  ;;  %2472 = vmatpush1.bf16.msra.mxu1 %v3577_v29 }
  0x8d   :  { %2474 = vmatprep.subr.bf16.mxu1 %v3580_v30  ;;  %281 = vmatmul.mubr.f32.gmra.mrb[14].mxu0 %v86_v28  ;;  %v3645_v28 = vpack.c.bf16 %v512_v27, %v508_v26 }
  0x8e   :  { %286 = vmatprep.mubr.f32.mxu0 %v3405_v0  ;;  %2536 = vmatpush1.bf16.msra.mxu0 %v3577_v29 }
  0x8f   :  { %406 = vmatmul.mubr.f32.gmra.mrb[16].mxu1 %v87_v33  ;;  %2570 = vmatprep.subr.bf16.mxu0 %v3508_v20 }
  0x90   :  { %583 = vmatprep.mubr.f32.mxu1 %v3405_v0 }
  0x91   :  { %287 = vmatmul.mubr.f32.gmra.mrb[16].mxu0 %v87_v33 }
  0x92   :  { %763 = vmatprep.mubr.f32.mxu0 %v3405_v0 }
  0x93   :  { %584 = vmatmul.mubr.f32.vlgmr.msra.gmra.mrb[18].mxu1 %v3405_v0 }
  0x94   :  { %2476 = vmatpush1.bf16.msra.mxu1 %v3592_v38  ;;  %654 = vmatprep.mubr.f32.mxu1 %v3405_v0 }
  0x95   :  { %2478 = vmatprep.subr.bf16.mxu1 %v3594_v39 }
  0x98   :  { %2480 = vmatpush1.bf16.msra.mxu1 %v3601_v46 }
  0x99   :  { %2482 = vmatprep.subr.bf16.mxu1 %v3605_v47 }
  0x9c   :  { %2484 = vmatpush1.bf16.msra.mxu1 %v3611_v52 }
  0x9d   :  { %2486 = vmatprep.subr.bf16.mxu1 %v3614_v53 }
  0xa0   :  { %2488 = vmatpush1.bf16.msra.mxu1 %v3620_v60 }
  0xa1   :  { %2490 = vmatprep.subr.bf16.mxu1 %v3623_v61 }
  0xa4   :  { %2492 = vmatpush1.bf16.msra.mxu1 %v3627_v5 }
  0xa5   :  { %2494 = vmatprep.subr.bf16.mxu1 %v3630_v6 }
  0xa8   :  { %2496 = vmatpush1.bf16.msra.mxu1 %v3633_v13 }
  0xa9   :  { %2498 = vmatprep.subr.bf16.mxu1 %v3636_v16 }
  0xac   :  { %2500 = vmatpush1.bf16.msra.mxu1 %v3639_v24 }
  0xad   :  { %2502 = vmatprep.subr.bf16.mxu1 %v3642_v25 }
  0xb0   :  { %2504 = vmatpush1.bf16.msra.mxu1 %v3645_v28 }
  0xb1   :  { %2538 = vmatprep.subr.bf16.mxu1 %v3580_v30 }
  0xb3   :  { %655 = vmatmul.mubr.f32.vlgmr.msra.gmra.mrb[0].mxu1 %v3405_v0 }
  0xb4   :  { %2540 = vmatpush1.bf16.msra.mxu1 %v3592_v38  ;;  %834 = vmatprep.mubr.f32.mxu1 %v3405_v0 }
  0xb5   :  { %2542 = vmatprep.subr.bf16.mxu1 %v3594_v39 }
  0xb8   :  { %2544 = vmatpush1.bf16.msra.mxu1 %v3601_v46 }
  0xb9   :  { %2546 = vmatprep.subr.bf16.mxu1 %v3605_v47 }
  0xbc   :  { %2548 = vmatpush1.bf16.msra.mxu1 %v3611_v52 }
  0xbd   :  { %2550 = vmatprep.subr.bf16.mxu1 %v3614_v53 }
  0xc0   :  { %2552 = vmatpush1.bf16.msra.mxu1 %v3620_v60 }
  0xc1   :  { %2554 = vmatprep.subr.bf16.mxu1 %v3623_v61 }
  0xc4   :  { %2556 = vmatpush1.bf16.msra.mxu1 %v3627_v5 }
  0xc5   :  { %2558 = vmatprep.subr.bf16.mxu1 %v3630_v6 }
  0xc8   :  { %2560 = vmatpush1.bf16.msra.mxu1 %v3633_v13 }
  0xc9   :  { %2562 = vmatprep.subr.bf16.mxu1 %v3636_v16 }
  0xcc   :  { %2564 = vmatpush1.bf16.msra.mxu1 %v3639_v24 }
  0xcd   :  { %2566 = vmatprep.subr.bf16.mxu1 %v3642_v25 }
  0xd0   :  { %2568 = vmatpush1.bf16.msra.mxu1 %v3645_v28 }
  0xd1   :  { %2602 = vmatprep.subr.bf16.mxu1 %v3580_v30 }
 0x144   :  { %v240_v33 = vpop.f32.mrb[0].mxu0 }
 0x145   :  { %v242_v34 = vpop.f32.mrb[1].mxu0  ;;  %v241_v48 = vadd.f32 %v240_v33, %v3677_v42 }
 0x146   :  { %v243_v49 = vadd.f32 %v242_v34, %v3681_v43 }
 0x166   :  { %v585_v50 = vpop.f32.mrb[18].mxu1 }
 0x167   :  { %v661_v51 = vadd.f32 %v585_v50, %v241_v48  ;;  %v587_v54 = vpop.f32.mrb[19].mxu1 }
 0x168   :  { %v662_v57 = vadd.f32 %v587_v54, %v243_v49 }
 0x169   :  { %v2350_v59 = vmul.f32 -1.442695, %v661_v51 }
 0x16a   :  { %v2351_v58 = vmul.f32 -1.442695, %v662_v57 }
 0x16c   :  { %3133 = vpow2.f32 %v2351_v58 }
 0x16d   :  { %3135 = vpow2.f32 %v2350_v59 }
 0x176   :  { %v3134_v2 = vpop.eup %3133 }
 0x177   :  { %v3136_v4 = vpop.eup %3135  ;;  %v674_v9 = vadd.f32 1.0, %v3134_v2 }
 0x178   :  { %v668_v11 = vadd.f32 1.0, %v3136_v4 }
 0x179   :  { %3137 = vrcp.f32 %v674_v9 }
 0x17a   :  { %3139 = vrcp.f32 %v668_v11 }
 0x183   :  { %v3138_v27 = vpop.eup %3137 }
 0x184   :  { %v3140_v33 = vpop.eup %3139  ;;  %v685_v35 = vmul.f32 0.0, %v3138_v27 }
 0x186   :  { %v656_v17 = vpop.f32.mrb[0].mxu1 }
 0x187   :  { %v3069_v18 = vadd.f32 %v656_v17, %v3687_v10  ;;  %v658_v19 = vpop.f32.mrb[1].mxu1 }
 0x188   :  { %v3070_v21 = vadd.f32 %v658_v19, %v3689_v12 }
 0x189   :  { %3141 = vtanh.f32 %v3069_v18 }
 0x18a   :  { %v2352_v26 = vmul.f32 -1.442695, %v3070_v21 }
 0x18c   :  { %3143 = vpow2.f32 %v2352_v26 }
 0x193   :  { %v3142_v34 = vpop.eup %3141 }
 0x194   :  { %v686_v48 = vmul.f32 %v3142_v34, %v3140_v33 }
 0x196   :  { %v3144_v49 = vpop.eup %3143  ;;  %v3693_v50 = vadd.f32 %v686_v48, %v685_v35 }
 0x197   :  { %v681_v40 = vadd.f32 1.0, %v3144_v49 }
 0x198   :  { %3145 = vtanh.f32 %v3693_v50 }
 0x199   :  { %3147 = vrcp.f32 %v681_v40 }
 0x1a2   :  { %v3146_v51 = vpop.eup %3145 }
 0x1a3   :  { %v3148_v54 = vpop.eup %3147 }
 0x1a4   :  { %v3696_v57 = vmul.f32 %v3148_v54, %v3146_v51 }
 0x1a6   :  { %764 = vmatmul.mubr.f32.vlgmr.msra.gmra.mrb[2].mxu0 %v3696_v57  ;;  %835 = vmatmul.mubr.f32.vlgmr.msra.gmra.mrb[2].mxu1 %v3696_v57 }
 0x1a7   :  { %2572 = vmatpush1.bf16.msra.mxu0 %v3512_v31  ;;  %2604 = vmatpush1.bf16.msra.mxu1 %v3592_v38 }
 0x1a8   :  { %2574 = vmatprep.subr.bf16.mxu0 %v3515_v32  ;;  %2606 = vmatprep.subr.bf16.mxu1 %v3594_v39 }
 0x1a9   :  { %944 = vmatprep.mubr.f32.mxu0 %v3405_v0  ;;  %1015 = vmatprep.mubr.f32.mxu1 %v3405_v0 }
 0x1ab   :  { %2576 = vmatpush1.bf16.msra.mxu0 %v3522_v44  ;;  %2608 = vmatpush1.bf16.msra.mxu1 %v3601_v46 }
 0x1ac   :  { %2578 = vmatprep.subr.bf16.mxu0 %v3525_v45  ;;  %2610 = vmatprep.subr.bf16.mxu1 %v3605_v47 }
 0x1af   :  { %2580 = vmatpush1.bf16.msra.mxu0 %v3530_v55  ;;  %2612 = vmatpush1.bf16.msra.mxu1 %v3611_v52 }
 0x1b0   :  { %2582 = vmatprep.subr.bf16.mxu0 %v3533_v56  ;;  %2614 = vmatprep.subr.bf16.mxu1 %v3614_v53 }
 0x1b3   :  { %2584 = vmatpush1.bf16.msra.mxu0 %v3537_v63  ;;  %2616 = vmatpush1.bf16.msra.mxu1 %v3620_v60 }
 0x1b4   :  { %2586 = vmatprep.subr.bf16.mxu0 %v3540_v1  ;;  %2618 = vmatprep.subr.bf16.mxu1 %v3623_v61 }
 0x1b7   :  { %2588 = vmatpush1.bf16.msra.mxu0 %v3545_v7  ;;  %2620 = vmatpush1.bf16.msra.mxu1 %v3627_v5 }
 0x1b8   :  { %2590 = vmatprep.subr.bf16.mxu0 %v3548_v8  ;;  %2622 = vmatprep.subr.bf16.mxu1 %v3630_v6 }
 0x1bb   :  { %2592 = vmatpush1.bf16.msra.mxu0 %v3556_v14  ;;  %2624 = vmatpush1.bf16.msra.mxu1 %v3633_v13 }
 0x1bc   :  { %2594 = vmatprep.subr.bf16.mxu0 %v3559_v15  ;;  %2626 = vmatprep.subr.bf16.mxu1 %v3636_v16 }
 0x1bf   :  { %2596 = vmatpush1.bf16.msra.mxu0 %v3567_v22  ;;  %2628 = vmatpush1.bf16.msra.mxu1 %v3639_v24 }
 0x1c0   :  { %2598 = vmatprep.subr.bf16.mxu0 %v3570_v23  ;;  %2630 = vmatprep.subr.bf16.mxu1 %v3642_v25 }
 0x1c3   :  { %2600 = vmatpush1.bf16.msra.mxu0 %v3577_v29  ;;  %2632 = vmatpush1.bf16.msra.mxu1 %v3645_v28 }
 0x1c4   :  { %2634 = vmatprep.subr.bf16.mxu0 %v3508_v20  ;;  %2666 = vmatprep.subr.bf16.mxu1 %v3580_v30 }
 0x279   :  { %v765_v58 = vpop.f32.mrb[2].mxu0  ;;  %v836_v59 = vpop.f32.mrb[2].mxu1 }
 0x27a   :  { %v3053_v62 = vadd.f32 %v765_v58, %v3677_v42  ;;  %v767_v2 = vpop.f32.mrb[3].mxu0  ;;  %v838_v3 = vpop.f32.mrb[3].mxu1  ;;  %v3071_v19 = vadd.f32 %v836_v59, %v3687_v10 }
 0x27b   :  { %v3054_v4 = vadd.f32 %v767_v2, %v3681_v43  ;;  %v3072_v17 = vadd.f32 %v838_v3, %v3689_v12 }
 0x27c   :  { %v2353_v9 = vmul.f32 -1.442695, %v3053_v62 }
 0x27d   :  { %v2354_v11 = vmul.f32 -1.442695, %v3054_v4  ;;  %v2355_v18 = vmul.f32 -1.442695, %v3072_v17 }
 0x27e   :  { %3149 = vpow2.f32 %v2353_v9 }
 0x27f   :  { %3151 = vpow2.f32 %v2354_v11 }
 0x280   :  { %3153 = vpow2.f32 %v2355_v18 }
 0x281   :  { %3155 = vtanh.f32 %v3071_v19 }
 0x288   :  { %v3150_v21 = vpop.eup %3149 }
 0x289   :  { %v3152_v26 = vpop.eup %3151  ;;  %v848_v27 = vadd.f32 1.0, %v3150_v21 }
 0x28a   :  { %v854_v33 = vadd.f32 1.0, %v3152_v26  ;;  %v3154_v34 = vpop.eup %3153 }
 0x28b   :  { %3157 = vrcp.f32 %v848_v27  ;;  %v3156_v35 = vpop.eup %3155  ;;  %v861_v51 = vadd.f32 1.0, %v3154_v34 }
 0x28c   :  { %3159 = vrcp.f32 %v854_v33 }
 0x28d   :  { %3161 = vrcp.f32 %v861_v51 }
 0x295   :  { %v3158_v48 = vpop.eup %3157 }
 0x296   :  { %v3160_v49 = vpop.eup %3159  ;;  %v866_v40 = vmul.f32 %v3158_v48, %v3156_v35 }
 0x297   :  { %v865_v54 = vmul.f32 %v3160_v49, %v3693_v50  ;;  %v3162_v59 = vpop.eup %3161 }
 0x299   :  { %v3739_v58 = vadd.f32 %v866_v40, %v865_v54 }
 0x29b   :  { %3163 = vtanh.f32 %v3739_v58 }
 0x2a5   :  { %v3164_v62 = vpop.eup %3163 }
 0x2a6   :  { %v3742_v2 = vmul.f32 %v3164_v62, %v3162_v59 }
 0x2a8   :  { %945 = vmatmul.mubr.f32.vlgmr.msra.gmra.mrb[4].mxu0 %v3742_v2  ;;  %1016 = vmatmul.mubr.f32.vlgmr.msra.gmra.mrb[4].mxu1 %v3742_v2 }
 0x2a9   :  { %2636 = vmatpush1.bf16.msra.mxu0 %v3512_v31  ;;  %2668 = vmatpush1.bf16.msra.mxu1 %v3592_v38 }
 0x2aa   :  { %2638 = vmatprep.subr.bf16.mxu0 %v3515_v32  ;;  %2670 = vmatprep.subr.bf16.mxu1 %v3594_v39 }
 0x2ab   :  { %1125 = vmatprep.mubr.f32.mxu0 %v3405_v0  ;;  %1196 = vmatprep.mubr.f32.mxu1 %v3405_v0 }
 0x2ad   :  { %2640 = vmatpush1.bf16.msra.mxu0 %v3522_v44  ;;  %2672 = vmatpush1.bf16.msra.mxu1 %v3601_v46 }
 0x2ae   :  { %2642 = vmatprep.subr.bf16.mxu0 %v3525_v45  ;;  %2674 = vmatprep.subr.bf16.mxu1 %v3605_v47 }
 0x2b1   :  { %2644 = vmatpush1.bf16.msra.mxu0 %v3530_v55  ;;  %2676 = vmatpush1.bf16.msra.mxu1 %v3611_v52 }
 0x2b2   :  { %2646 = vmatprep.subr.bf16.mxu0 %v3533_v56  ;;  %2678 = vmatprep.subr.bf16.mxu1 %v3614_v53 }
 0x2b5   :  { %2648 = vmatpush1.bf16.msra.mxu0 %v3537_v63  ;;  %2680 = vmatpush1.bf16.msra.mxu1 %v3620_v60 }
 0x2b6   :  { %2650 = vmatprep.subr.bf16.mxu0 %v3540_v1  ;;  %2682 = vmatprep.subr.bf16.mxu1 %v3623_v61 }
 0x2b9   :  { %2652 = vmatpush1.bf16.msra.mxu0 %v3545_v7  ;;  %2684 = vmatpush1.bf16.msra.mxu1 %v3627_v5 }
 0x2ba   :  { %2654 = vmatprep.subr.bf16.mxu0 %v3548_v8  ;;  %2686 = vmatprep.subr.bf16.mxu1 %v3630_v6 }
 0x2bd   :  { %2656 = vmatpush1.bf16.msra.mxu0 %v3556_v14  ;;  %2688 = vmatpush1.bf16.msra.mxu1 %v3633_v13 }
 0x2be   :  { %2658 = vmatprep.subr.bf16.mxu0 %v3559_v15  ;;  %2690 = vmatprep.subr.bf16.mxu1 %v3636_v16 }
 0x2c1   :  { %2660 = vmatpush1.bf16.msra.mxu0 %v3567_v22  ;;  %2692 = vmatpush1.bf16.msra.mxu1 %v3639_v24 }
 0x2c2   :  { %2662 = vmatprep.subr.bf16.mxu0 %v3570_v23  ;;  %2694 = vmatprep.subr.bf16.mxu1 %v3642_v25 }
 0x2c5   :  { %2664 = vmatpush1.bf16.msra.mxu0 %v3577_v29  ;;  %2696 = vmatpush1.bf16.msra.mxu1 %v3645_v28 }
 0x2c6   :  { %2698 = vmatprep.subr.bf16.mxu0 %v3508_v20  ;;  %2730 = vmatprep.subr.bf16.mxu1 %v3580_v30 }
 0x37b   :  { %v946_v50 = vpop.f32.mrb[4].mxu0  ;;  %v1017_v3 = vpop.f32.mrb[4].mxu1 }
 0x37c   :  { %v3055_v4 = vadd.f32 %v946_v50, %v3677_v42  ;;  %v948_v9 = vpop.f32.mrb[5].mxu0  ;;  %v1019_v11 = vpop.f32.mrb[5].mxu1  ;;  %v3073_v27 = vadd.f32 %v1017_v3, %v3687_v10 }
 0x37d   :  { %v3056_v17 = vadd.f32 %v948_v9, %v3681_v43  ;;  %v3074_v21 = vadd.f32 %v1019_v11, %v3689_v12 }
 0x37e   :  { %v2356_v18 = vmul.f32 -1.442695, %v3055_v4 }
 0x37f   :  { %v2357_v19 = vmul.f32 -1.442695, %v3056_v17  ;;  %v2358_v26 = vmul.f32 -1.442695, %v3074_v21 }
 0x380   :  { %3165 = vpow2.f32 %v2356_v18 }
 0x381   :  { %3167 = vpow2.f32 %v2357_v19 }
 0x382   :  { %3169 = vpow2.f32 %v2358_v26 }
 0x383   :  { %3171 = vtanh.f32 %v3073_v27 }
 0x38a   :  { %v3166_v33 = vpop.eup %3165 }
 0x38b   :  { %v3168_v34 = vpop.eup %3167  ;;  %v1029_v35 = vadd.f32 1.0, %v3166_v33 }
 0x38c   :  { %v1035_v48 = vadd.f32 1.0, %v3168_v34  ;;  %v3170_v49 = vpop.eup %3169 }
 0x38d   :  { %3173 = vrcp.f32 %v1029_v35  ;;  %v3172_v40 = vpop.eup %3171  ;;  %v1042_v62 = vadd.f32 1.0, %v3170_v49 }
 0x38e   :  { %3175 = vrcp.f32 %v1035_v48 }
 0x38f   :  { %3177 = vrcp.f32 %v1042_v62 }
 0x397   :  { %v3174_v51 = vpop.eup %3173 }
 0x398   :  { %v3176_v54 = vpop.eup %3175  ;;  %v1047_v59 = vmul.f32 %v3174_v51, %v3172_v40 }
 0x399   :  { %v1046_v50 = vmul.f32 %v3176_v54, %v3739_v58  ;;  %v3178_v3 = vpop.eup %3177 }
 0x39b   :  { %v3785_v4 = vadd.f32 %v1047_v59, %v1046_v50 }
 0x39d   :  { %3179 = vtanh.f32 %v3785_v4 }
 0x3a7   :  { %v3180_v9 = vpop.eup %3179 }
 0x3a8   :  { %v3788_v11 = vmul.f32 %v3180_v9, %v3178_v3 }
 0x3aa   :  { %1126 = vmatmul.mubr.f32.vlgmr.msra.gmra.mrb[6].mxu0 %v3788_v11  ;;  %1197 = vmatmul.mubr.f32.vlgmr.msra.gmra.mrb[6].mxu1 %v3788_v11 }
 0x3ab   :  { %2700 = vmatpush1.bf16.msra.mxu0 %v3512_v31  ;;  %2732 = vmatpush1.bf16.msra.mxu1 %v3592_v38 }
 0x3ac   :  { %2702 = vmatprep.subr.bf16.mxu0 %v3515_v32  ;;  %2734 = vmatprep.subr.bf16.mxu1 %v3594_v39 }
 0x3ad   :  { %1306 = vmatprep.mubr.f32.mxu0 %v3405_v0  ;;  %1377 = vmatprep.mubr.f32.mxu1 %v3405_v0 }
 0x3af   :  { %2704 = vmatpush1.bf16.msra.mxu0 %v3522_v44  ;;  %2736 = vmatpush1.bf16.msra.mxu1 %v3601_v46 }
 0x3b0   :  { %2706 = vmatprep.subr.bf16.mxu0 %v3525_v45  ;;  %2738 = vmatprep.subr.bf16.mxu1 %v3605_v47 }
 0x3b3   :  { %2708 = vmatpush1.bf16.msra.mxu0 %v3530_v55  ;;  %2740 = vmatpush1.bf16.msra.mxu1 %v3611_v52 }
 0x3b4   :  { %2710 = vmatprep.subr.bf16.mxu0 %v3533_v56  ;;  %2742 = vmatprep.subr.bf16.mxu1 %v3614_v53 }
 0x3b7   :  { %2712 = vmatpush1.bf16.msra.mxu0 %v3537_v63  ;;  %2744 = vmatpush1.bf16.msra.mxu1 %v3620_v60 }
 0x3b8   :  { %2714 = vmatprep.subr.bf16.mxu0 %v3540_v1  ;;  %2746 = vmatprep.subr.bf16.mxu1 %v3623_v61 }
 0x3bb   :  { %2716 = vmatpush1.bf16.msra.mxu0 %v3545_v7  ;;  %2748 = vmatpush1.bf16.msra.mxu1 %v3627_v5 }
 0x3bc   :  { %2718 = vmatprep.subr.bf16.mxu0 %v3548_v8  ;;  %2750 = vmatprep.subr.bf16.mxu1 %v3630_v6 }
 0x3bf   :  { %2720 = vmatpush1.bf16.msra.mxu0 %v3556_v14  ;;  %2752 = vmatpush1.bf16.msra.mxu1 %v3633_v13 }
 0x3c0   :  { %2722 = vmatprep.subr.bf16.mxu0 %v3559_v15  ;;  %2754 = vmatprep.subr.bf16.mxu1 %v3636_v16 }
 0x3c3   :  { %2724 = vmatpush1.bf16.msra.mxu0 %v3567_v22  ;;  %2756 = vmatpush1.bf16.msra.mxu1 %v3639_v24 }
 0x3c4   :  { %2726 = vmatprep.subr.bf16.mxu0 %v3570_v23  ;;  %2758 = vmatprep.subr.bf16.mxu1 %v3642_v25 }
 0x3c7   :  { %2728 = vmatpush1.bf16.msra.mxu0 %v3577_v29  ;;  %2760 = vmatpush1.bf16.msra.mxu1 %v3645_v28 }
 0x3c8   :  { %2762 = vmatprep.subr.bf16.mxu0 %v3508_v20  ;;  %2794 = vmatprep.subr.bf16.mxu1 %v3580_v30 }
 0x47d   :  { %v1127_v58 = vpop.f32.mrb[6].mxu0  ;;  %v1198_v17 = vpop.f32.mrb[6].mxu1 }
 0x47e   :  { %v3057_v18 = vadd.f32 %v1127_v58, %v3677_v42  ;;  %v1129_v19 = vpop.f32.mrb[7].mxu0  ;;  %v1200_v21 = vpop.f32.mrb[7].mxu1  ;;  %v3075_v48 = vadd.f32 %v1198_v17, %v3687_v10 }
 0x47f   :  { %v3058_v26 = vadd.f32 %v1129_v19, %v3681_v43  ;;  %v3076_v34 = vadd.f32 %v1200_v21, %v3689_v12 }
 0x480   :  { %v2359_v27 = vmul.f32 -1.442695, %v3057_v18 }
 0x481   :  { %v2360_v33 = vmul.f32 -1.442695, %v3058_v26  ;;  %v2361_v35 = vmul.f32 -1.442695, %v3076_v34 }
 0x482   :  { %3181 = vpow2.f32 %v2359_v27 }
 0x483   :  { %3183 = vpow2.f32 %v2360_v33 }
 0x484   :  { %3185 = vpow2.f32 %v2361_v35 }
 0x485   :  { %3187 = vtanh.f32 %v3075_v48 }
 0x48c   :  { %v3182_v49 = vpop.eup %3181 }
 0x48d   :  { %v3184_v40 = vpop.eup %3183  ;;  %v1210_v51 = vadd.f32 1.0, %v3182_v49 }
 0x48e   :  { %v1216_v54 = vadd.f32 1.0, %v3184_v40  ;;  %v3186_v59 = vpop.eup %3185 }
 0x48f   :  { %3189 = vrcp.f32 %v1210_v51  ;;  %v3188_v62 = vpop.eup %3187  ;;  %v1223_v58 = vadd.f32 1.0, %v3186_v59 }
 0x490   :  { %3191 = vrcp.f32 %v1216_v54 }
 0x491   :  { %3193 = vrcp.f32 %v1223_v58 }
 0x499   :  { %v3190_v50 = vpop.eup %3189 }
 0x49a   :  { %v3192_v3 = vpop.eup %3191  ;;  %v1228_v9 = vmul.f32 %v3190_v50, %v3188_v62 }
 0x49b   :  { %v1227_v18 = vmul.f32 %v3192_v3, %v3785_v4  ;;  %v3194_v17 = vpop.eup %3193 }
 0x49d   :  { %v3831_v19 = vadd.f32 %v1228_v9, %v1227_v18 }
 0x49f   :  { %3195 = vtanh.f32 %v3831_v19 }
 0x4a9   :  { %v3196_v21 = vpop.eup %3195 }
 0x4aa   :  { %v3834_v26 = vmul.f32 %v3196_v21, %v3194_v17 }
 0x4ac   :  { %1307 = vmatmul.mubr.f32.vlgmr.msra.gmra.mrb[8].mxu0 %v3834_v26  ;;  %1378 = vmatmul.mubr.f32.vlgmr.msra.gmra.mrb[8].mxu1 %v3834_v26 }
 0x4ad   :  { %2764 = vmatpush1.bf16.msra.mxu0 %v3512_v31  ;;  %2796 = vmatpush1.bf16.msra.mxu1 %v3592_v38 }
 0x4ae   :  { %2766 = vmatprep.subr.bf16.mxu0 %v3515_v32  ;;  %2798 = vmatprep.subr.bf16.mxu1 %v3594_v39 }
 0x4af   :  { %1487 = vmatprep.mubr.f32.mxu0 %v3405_v0  ;;  %1558 = vmatprep.mubr.f32.mxu1 %v3405_v0 }
 0x4b1   :  { %2768 = vmatpush1.bf16.msra.mxu0 %v3522_v44  ;;  %2800 = vmatpush1.bf16.msra.mxu1 %v3601_v46 }
 0x4b2   :  { %2770 = vmatprep.subr.bf16.mxu0 %v3525_v45  ;;  %2802 = vmatprep.subr.bf16.mxu1 %v3605_v47 }
 0x4b5   :  { %2772 = vmatpush1.bf16.msra.mxu0 %v3530_v55  ;;  %2804 = vmatpush1.bf16.msra.mxu1 %v3611_v52 }
 0x4b6   :  { %2774 = vmatprep.subr.bf16.mxu0 %v3533_v56  ;;  %2806 = vmatprep.subr.bf16.mxu1 %v3614_v53 }
 0x4b9   :  { %2776 = vmatpush1.bf16.msra.mxu0 %v3537_v63  ;;  %2808 = vmatpush1.bf16.msra.mxu1 %v3620_v60 }
 0x4ba   :  { %2778 = vmatprep.subr.bf16.mxu0 %v3540_v1  ;;  %2810 = vmatprep.subr.bf16.mxu1 %v3623_v61 }
 0x4bd   :  { %2780 = vmatpush1.bf16.msra.mxu0 %v3545_v7  ;;  %2812 = vmatpush1.bf16.msra.mxu1 %v3627_v5 }
 0x4be   :  { %2782 = vmatprep.subr.bf16.mxu0 %v3548_v8  ;;  %2814 = vmatprep.subr.bf16.mxu1 %v3630_v6 }
 0x4c1   :  { %2784 = vmatpush1.bf16.msra.mxu0 %v3556_v14  ;;  %2816 = vmatpush1.bf16.msra.mxu1 %v3633_v13 }
 0x4c2   :  { %2786 = vmatprep.subr.bf16.mxu0 %v3559_v15  ;;  %2818 = vmatprep.subr.bf16.mxu1 %v3636_v16 }
 0x4c5   :  { %2788 = vmatpush1.bf16.msra.mxu0 %v3567_v22  ;;  %2820 = vmatpush1.bf16.msra.mxu1 %v3639_v24 }
 0x4c6   :  { %2790 = vmatprep.subr.bf16.mxu0 %v3570_v23  ;;  %2822 = vmatprep.subr.bf16.mxu1 %v3642_v25 }
 0x4c9   :  { %2792 = vmatpush1.bf16.msra.mxu0 %v3577_v29  ;;  %2824 = vmatpush1.bf16.msra.mxu1 %v3645_v28 }
 0x4ca   :  { %2826 = vmatprep.subr.bf16.mxu0 %v3508_v20  ;;  %2858 = vmatprep.subr.bf16.mxu1 %v3580_v30 }
 0x57f   :  { %v1308_v4 = vpop.f32.mrb[8].mxu0  ;;  %v1379_v27 = vpop.f32.mrb[8].mxu1 }
 0x580   :  { %v3059_v33 = vadd.f32 %v1308_v4, %v3677_v42  ;;  %v1310_v34 = vpop.f32.mrb[9].mxu0  ;;  %v1381_v35 = vpop.f32.mrb[9].mxu1  ;;  %v3077_v59 = vadd.f32 %v1379_v27, %v3687_v10 }
 0x581   :  { %v3060_v48 = vadd.f32 %v1310_v34, %v3681_v43  ;;  %v3078_v51 = vadd.f32 %v1381_v35, %v3689_v12 }
 0x582   :  { %v2362_v49 = vmul.f32 -1.442695, %v3059_v33 }
 0x583   :  { %v2363_v40 = vmul.f32 -1.442695, %v3060_v48  ;;  %v2364_v54 = vmul.f32 -1.442695, %v3078_v51 }
 0x584   :  { %3197 = vpow2.f32 %v2362_v49 }
 0x585   :  { %3199 = vpow2.f32 %v2363_v40 }
 0x586   :  { %3201 = vpow2.f32 %v2364_v54 }
 0x587   :  { %3203 = vtanh.f32 %v3077_v59 }
 0x58e   :  { %v3198_v62 = vpop.eup %3197 }
 0x58f   :  { %v3200_v50 = vpop.eup %3199  ;;  %v1391_v3 = vadd.f32 1.0, %v3198_v62 }
 0x590   :  { %v1397_v9 = vadd.f32 1.0, %v3200_v50  ;;  %v3202_v58 = vpop.eup %3201 }
 0x591   :  { %3205 = vrcp.f32 %v1391_v3  ;;  %v3204_v18 = vpop.eup %3203  ;;  %v1404_v33 = vadd.f32 1.0, %v3202_v58 }
 0x592   :  { %3207 = vrcp.f32 %v1397_v9 }
 0x593   :  { %3209 = vrcp.f32 %v1404_v33 }
 0x59b   :  { %v3206_v17 = vpop.eup %3205 }
 0x59c   :  { %v3208_v21 = vpop.eup %3207  ;;  %v1409_v4 = vmul.f32 %v3206_v17, %v3204_v18 }
 0x59d   :  { %v1408_v34 = vmul.f32 %v3208_v21, %v3831_v19  ;;  %v3210_v27 = vpop.eup %3209 }
 0x59f   :  { %v3877_v35 = vadd.f32 %v1409_v4, %v1408_v34 }
 0x5a1   :  { %3211 = vtanh.f32 %v3877_v35 }
 0x5ab   :  { %v3212_v48 = vpop.eup %3211 }
 0x5ac   :  { %v3880_v49 = vmul.f32 %v3212_v48, %v3210_v27 }
 0x5ae   :  { %1488 = vmatmul.mubr.f32.vlgmr.msra.gmra.mrb[10].mxu0 %v3880_v49  ;;  %1559 = vmatmul.mubr.f32.vlgmr.msra.gmra.mrb[10].mxu1 %v3880_v49 }
 0x5af   :  { %2828 = vmatpush1.bf16.msra.mxu0 %v3512_v31  ;;  %2860 = vmatpush1.bf16.msra.mxu1 %v3592_v38 }
 0x5b0   :  { %2830 = vmatprep.subr.bf16.mxu0 %v3515_v32  ;;  %2862 = vmatprep.subr.bf16.mxu1 %v3594_v39 }
 0x5b1   :  { %1668 = vmatprep.mubr.f32.mxu0 %v3405_v0  ;;  %1739 = vmatprep.mubr.f32.mxu1 %v3405_v0 }
 0x5b3   :  { %2832 = vmatpush1.bf16.msra.mxu0 %v3522_v44  ;;  %2864 = vmatpush1.bf16.msra.mxu1 %v3601_v46 }
 0x5b4   :  { %2834 = vmatprep.subr.bf16.mxu0 %v3525_v45  ;;  %2866 = vmatprep.subr.bf16.mxu1 %v3605_v47 }
 0x5b7   :  { %2836 = vmatpush1.bf16.msra.mxu0 %v3530_v55  ;;  %2868 = vmatpush1.bf16.msra.mxu1 %v3611_v52 }
 0x5b8   :  { %2838 = vmatprep.subr.bf16.mxu0 %v3533_v56  ;;  %2870 = vmatprep.subr.bf16.mxu1 %v3614_v53 }
 0x5bb   :  { %2840 = vmatpush1.bf16.msra.mxu0 %v3537_v63  ;;  %2872 = vmatpush1.bf16.msra.mxu1 %v3620_v60 }
 0x5bc   :  { %2842 = vmatprep.subr.bf16.mxu0 %v3540_v1  ;;  %2874 = vmatprep.subr.bf16.mxu1 %v3623_v61 }
 0x5bf   :  { %2844 = vmatpush1.bf16.msra.mxu0 %v3545_v7  ;;  %2876 = vmatpush1.bf16.msra.mxu1 %v3627_v5 }
 0x5c0   :  { %2846 = vmatprep.subr.bf16.mxu0 %v3548_v8  ;;  %2878 = vmatprep.subr.bf16.mxu1 %v3630_v6 }
 0x5c3   :  { %2848 = vmatpush1.bf16.msra.mxu0 %v3556_v14  ;;  %2880 = vmatpush1.bf16.msra.mxu1 %v3633_v13 }
 0x5c4   :  { %2850 = vmatprep.subr.bf16.mxu0 %v3559_v15  ;;  %2882 = vmatprep.subr.bf16.mxu1 %v3636_v16 }
 0x5c7   :  { %2852 = vmatpush1.bf16.msra.mxu0 %v3567_v22  ;;  %2884 = vmatpush1.bf16.msra.mxu1 %v3639_v24 }
 0x5c8   :  { %2854 = vmatprep.subr.bf16.mxu0 %v3570_v23  ;;  %2886 = vmatprep.subr.bf16.mxu1 %v3642_v25 }
 0x5cb   :  { %2856 = vmatpush1.bf16.msra.mxu0 %v3577_v29  ;;  %2888 = vmatpush1.bf16.msra.mxu1 %v3645_v28 }
 0x5cc   :  { %2890 = vmatprep.subr.bf16.mxu0 %v3508_v20  ;;  %2922 = vmatprep.subr.bf16.mxu1 %v3580_v30 }
 0x681   :  { %v1489_v19 = vpop.f32.mrb[10].mxu0  ;;  %v1560_v40 = vpop.f32.mrb[10].mxu1 }
 0x682   :  { %v3061_v51 = vadd.f32 %v1489_v19, %v3677_v42  ;;  %v1491_v54 = vpop.f32.mrb[11].mxu0  ;;  %v1562_v59 = vpop.f32.mrb[11].mxu1  ;;  %v3079_v18 = vadd.f32 %v1560_v40, %v3687_v10 }
 0x683   :  { %v3062_v62 = vadd.f32 %v1491_v54, %v3681_v43  ;;  %v3080_v9 = vadd.f32 %v1562_v59, %v3689_v12 }
 0x684   :  { %v2365_v50 = vmul.f32 -1.442695, %v3061_v51 }
 0x685   :  { %v2366_v3 = vmul.f32 -1.442695, %v3062_v62  ;;  %v2367_v58 = vmul.f32 -1.442695, %v3080_v9 }
 0x686   :  { %3213 = vpow2.f32 %v2365_v50 }
 0x687   :  { %3215 = vpow2.f32 %v2366_v3 }
 0x688   :  { %3217 = vpow2.f32 %v2367_v58 }
 0x689   :  { %3219 = vtanh.f32 %v3079_v18 }
 0x690   :  { %v3214_v17 = vpop.eup %3213 }
 0x691   :  { %v3216_v21 = vpop.eup %3215  ;;  %v1572_v4 = vadd.f32 1.0, %v3214_v17 }
 0x692   :  { %v1578_v33 = vadd.f32 1.0, %v3216_v21  ;;  %v3218_v34 = vpop.eup %3217 }
 0x693   :  { %3221 = vrcp.f32 %v1572_v4  ;;  %v3220_v27 = vpop.eup %3219  ;;  %v1585_v54 = vadd.f32 1.0, %v3218_v34 }
 0x694   :  { %3223 = vrcp.f32 %v1578_v33 }
 0x695   :  { %3225 = vrcp.f32 %v1585_v54 }
 0x69d   :  { %v3222_v48 = vpop.eup %3221 }
 0x69e   :  { %v3224_v19 = vpop.eup %3223  ;;  %v1590_v51 = vmul.f32 %v3222_v48, %v3220_v27 }
 0x69f   :  { %v1589_v62 = vmul.f32 %v3224_v19, %v3877_v35  ;;  %v3226_v40 = vpop.eup %3225 }
 0x6a1   :  { %v3923_v59 = vadd.f32 %v1590_v51, %v1589_v62 }
 0x6a3   :  { %3227 = vtanh.f32 %v3923_v59 }
 0x6ad   :  { %v3228_v50 = vpop.eup %3227 }
 0x6ae   :  { %v3926_v3 = vmul.f32 %v3228_v50, %v3226_v40 }
 0x6b0   :  { %1669 = vmatmul.mubr.f32.vlgmr.msra.gmra.mrb[12].mxu0 %v3926_v3  ;;  %1740 = vmatmul.mubr.f32.vlgmr.msra.gmra.mrb[12].mxu1 %v3926_v3 }
 0x6b1   :  { %2892 = vmatpush1.bf16.msra.mxu0 %v3512_v31  ;;  %2924 = vmatpush1.bf16.msra.mxu1 %v3592_v38 }
 0x6b2   :  { %2894 = vmatprep.subr.bf16.mxu0 %v3515_v32  ;;  %2926 = vmatprep.subr.bf16.mxu1 %v3594_v39 }
 0x6b3   :  { %1849 = vmatprep.mubr.f32.mxu0 %v3405_v0  ;;  %1920 = vmatprep.mubr.f32.mxu1 %v3405_v0 }
 0x6b5   :  { %2896 = vmatpush1.bf16.msra.mxu0 %v3522_v44  ;;  %2928 = vmatpush1.bf16.msra.mxu1 %v3601_v46 }
 0x6b6   :  { %2898 = vmatprep.subr.bf16.mxu0 %v3525_v45  ;;  %2930 = vmatprep.subr.bf16.mxu1 %v3605_v47 }
 0x6b9   :  { %2900 = vmatpush1.bf16.msra.mxu0 %v3530_v55  ;;  %2932 = vmatpush1.bf16.msra.mxu1 %v3611_v52 }
 0x6ba   :  { %2902 = vmatprep.subr.bf16.mxu0 %v3533_v56  ;;  %2934 = vmatprep.subr.bf16.mxu1 %v3614_v53 }
 0x6bd   :  { %2904 = vmatpush1.bf16.msra.mxu0 %v3537_v63  ;;  %2936 = vmatpush1.bf16.msra.mxu1 %v3620_v60 }
 0x6be   :  { %2906 = vmatprep.subr.bf16.mxu0 %v3540_v1  ;;  %2938 = vmatprep.subr.bf16.mxu1 %v3623_v61 }
 0x6c1   :  { %2908 = vmatpush1.bf16.msra.mxu0 %v3545_v7  ;;  %2940 = vmatpush1.bf16.msra.mxu1 %v3627_v5 }
 0x6c2   :  { %2910 = vmatprep.subr.bf16.mxu0 %v3548_v8  ;;  %2942 = vmatprep.subr.bf16.mxu1 %v3630_v6 }
 0x6c5   :  { %2912 = vmatpush1.bf16.msra.mxu0 %v3556_v14  ;;  %2944 = vmatpush1.bf16.msra.mxu1 %v3633_v13 }
 0x6c6   :  { %2914 = vmatprep.subr.bf16.mxu0 %v3559_v15  ;;  %2946 = vmatprep.subr.bf16.mxu1 %v3636_v16 }
 0x6c9   :  { %2916 = vmatpush1.bf16.msra.mxu0 %v3567_v22  ;;  %2948 = vmatpush1.bf16.msra.mxu1 %v3639_v24 }
 0x6ca   :  { %2918 = vmatprep.subr.bf16.mxu0 %v3570_v23  ;;  %2950 = vmatprep.subr.bf16.mxu1 %v3642_v25 }
 0x6cd   :  { %2920 = vmatpush1.bf16.msra.mxu0 %v3577_v29  ;;  %2952 = vmatpush1.bf16.msra.mxu1 %v3645_v28 }
 0x6ce   :  { %2954 = vmatprep.subr.bf16.mxu0 %v3508_v20  ;;  %2986 = vmatprep.subr.bf16.mxu1 %v3580_v30 }
 0x783   :  { %v1670_v35 = vpop.f32.mrb[12].mxu0  ;;  %v1741_v9 = vpop.f32.mrb[12].mxu1 }
 0x784   :  { %v3063_v58 = vadd.f32 %v1670_v35, %v3677_v42  ;;  %v1672_v18 = vpop.f32.mrb[13].mxu0  ;;  %v1743_v17 = vpop.f32.mrb[13].mxu1  ;;  %v3081_v48 = vadd.f32 %v1741_v9, %v3687_v10 }
 0x785   :  { %v3064_v21 = vadd.f32 %v1672_v18, %v3681_v43  ;;  %v3082_v34 = vadd.f32 %v1743_v17, %v3689_v12 }
 0x786   :  { %v2368_v4 = vmul.f32 -1.442695, %v3063_v58 }
 0x787   :  { %v2369_v33 = vmul.f32 -1.442695, %v3064_v21  ;;  %v2370_v27 = vmul.f32 -1.442695, %v3082_v34 }
 0x788   :  { %3229 = vpow2.f32 %v2368_v4 }
 0x789   :  { %3231 = vpow2.f32 %v2369_v33 }
 0x78a   :  { %3233 = vpow2.f32 %v2370_v27 }
 0x78b   :  { %3235 = vtanh.f32 %v3081_v48 }
 0x792   :  { %v3230_v20 = vpop.eup %3229 }
 0x793   :  { %v3232_v19 = vpop.eup %3231  ;;  %v1753_v30 = vadd.f32 1.0, %v3230_v20  ;;  %v2154_v20 = vld [vmem:[#allocation12 + $0x20] sm:$0xff] }
 0x794   :  { %v1759_v51 = vadd.f32 1.0, %v3232_v19  ;;  %v3234_v54 = vpop.eup %3233  ;;  %v2156_v19 = vld [vmem:[#allocation12 + $0x30] sm:$0xff] }
 0x795   :  { %3237 = vrcp.f32 %v1753_v30  ;;  %v3236_v62 = vpop.eup %3235  ;;  %v1766_v58 = vadd.f32 1.0, %v3234_v54  ;;  %v2159_v30 = vld [vmem:[#allocation12 + $0x48] sm:$0xff]  ;;  %v3023_v54 = vpack.c.bf16 %v2156_v19, %v2154_v20 }
 0x796   :  { %3239 = vrcp.f32 %v1759_v51  ;;  %v2161_v51 = vld [vmem:[#allocation12 + $0x58] sm:$0xff] }
 0x797   :  { %3241 = vrcp.f32 %v1766_v58  ;;  %v2165_v58 = vld [vmem:[#allocation12 + $0x78] sm:$0xff] }
 0x79f   :  { %v3238_v40 = vpop.eup %3237 }
 0x7a0   :  { %v3240_v50 = vpop.eup %3239  ;;  %v1771_v35 = vmul.f32 %v3238_v40, %v3236_v62  ;;  %v3025_v62 = vpack.c.bf16 %v2161_v51, %v2159_v30  ;;  %v2158_v40 = vld [vmem:[#allocation12 + $0x40] sm:$0xff] }
 0x7a1   :  { %v1770_v18 = vmul.f32 %v3240_v50, %v3923_v59  ;;  %v3242_v9 = vpop.eup %3241  ;;  %v2160_v50 = vld [vmem:[#allocation12 + $0x50] sm:$0xff] }
 0x7a3   :  { %v3969_v17 = vadd.f32 %v1771_v35, %v1770_v18  ;;  %v2163_v35 = vld [vmem:[#allocation12 + $0x68] sm:$0xff]  ;;  %v3027_v18 = vpack.c.bf16 %v2160_v50, %v2158_v40 }
 0x7a5   :  { %3243 = vtanh.f32 %v3969_v17 }
 0x7af   :  { %v3244_v21 = vpop.eup %3243 }
 0x7b0   :  { %v3972_v4 = vmul.f32 %v3244_v21, %v3242_v9  ;;  %v2162_v9 = vld [vmem:[#allocation12 + $0x60] sm:$0xff]  ;;  %v2164_v21 = vld [vmem:[#allocation12 + $0x70] sm:$0xff] }
 0x7b2   :  { %1850 = vmatmul.mubr.f32.vlgmr.msra.gmra.mrb[14].mxu0 %v3972_v4  ;;  %1921 = vmatmul.mubr.f32.vlgmr.msra.gmra.mrb[14].mxu1 %v3972_v4 }
 0x7b3   :  { %2956 = vmatpush1.bf16.msra.mxu0 %v3512_v31  ;;  %2988 = vmatpush1.bf16.msra.mxu1 %v3592_v38  ;;  %v2151_v31 = vld [vmem:[#allocation12 + $0x8] sm:$0xff] }
 0x7b4   :  { %2958 = vmatprep.subr.bf16.mxu0 %v3515_v32  ;;  %2990 = vmatprep.subr.bf16.mxu1 %v3594_v39  ;;  %v2153_v32 = vld [vmem:[#allocation12 + $0x18] sm:$0xff] }
 0x7b5   :  { %2030 = vmatprep.mubr.f32.mxu0 %v3405_v0  ;;  %2101 = vmatprep.mubr.f32.mxu1 %v3405_v0 }
 0x7b7   :  { %2960 = vmatpush1.bf16.msra.mxu0 %v3522_v44  ;;  %2992 = vmatpush1.bf16.msra.mxu1 %v3601_v46  ;;  %v3017_v44 = vpack.c.bf16 %v2153_v32, %v2151_v31  ;;  %v2167_v31 = vld [vmem:[#allocation12 + $0x88] sm:$0xff]  ;;  %v2169_v32 = vld [vmem:[#allocation12 + $0x98] sm:$0xff] }
 0x7b8   :  { %2962 = vmatprep.subr.bf16.mxu0 %v3525_v45  ;;  %2994 = vmatprep.subr.bf16.mxu1 %v3605_v47 }
 0x7bb   :  { %2964 = vmatpush1.bf16.msra.mxu0 %v3530_v55  ;;  %2996 = vmatpush1.bf16.msra.mxu1 %v3611_v52 }
 0x7bc   :  { %2966 = vmatprep.subr.bf16.mxu0 %v3533_v56  ;;  %2998 = vmatprep.subr.bf16.mxu1 %v3614_v53 }
 0x7bf   :  { %2968 = vmatpush1.bf16.msra.mxu0 %v3537_v63  ;;  %3000 = vmatpush1.bf16.msra.mxu1 %v3620_v60 }
 0x7c0   :  { %2970 = vmatprep.subr.bf16.mxu0 %v3540_v1  ;;  %3002 = vmatprep.subr.bf16.mxu1 %v3623_v61 }
 0x7c3   :  { %2972 = vmatpush1.bf16.msra.mxu0 %v3545_v7  ;;  %3004 = vmatpush1.bf16.msra.mxu1 %v3627_v5 }
 0x7c4   :  { %2974 = vmatprep.subr.bf16.mxu0 %v3548_v8  ;;  %3006 = vmatprep.subr.bf16.mxu1 %v3630_v6 }
 0x7c7   :  { %2976 = vmatpush1.bf16.msra.mxu0 %v3556_v14  ;;  %3008 = vmatpush1.bf16.msra.mxu1 %v3633_v13 }
 0x7c8   :  { %2978 = vmatprep.subr.bf16.mxu0 %v3559_v15  ;;  %3010 = vmatprep.subr.bf16.mxu1 %v3636_v16  ;;  %v2150_v16 = vld [vmem:[#allocation12] sm:$0xff] }
 0x7cb   :  { %2980 = vmatpush1.bf16.msra.mxu0 %v3567_v22  ;;  %3012 = vmatpush1.bf16.msra.mxu1 %v3639_v24  ;;  %v2152_v24 = vld [vmem:[#allocation12 + $0x10] sm:$0xff] }
 0x7cc   :  { %2982 = vmatprep.subr.bf16.mxu0 %v3570_v23  ;;  %3014 = vmatprep.subr.bf16.mxu1 %v3642_v25  ;;  %v2155_v25 = vld [vmem:[#allocation12 + $0x28] sm:$0xff]  ;;  %v3019_v34 = vpack.c.bf16 %v2152_v24, %v2150_v16 }
 0x7cf   :  { %2984 = vmatpush1.bf16.msra.mxu0 %v3577_v29  ;;  %3016 = vmatpush1.bf16.msra.mxu1 %v3645_v28  ;;  %v2157_v28 = vld [vmem:[#allocation12 + $0x38] sm:$0xff] }
 0x7d0   :  { %3018 = vmatprep.subr.bf16.mxu0 %v3017_v44  ;;  %v3021_v48 = vpack.c.bf16 %v2157_v28, %v2155_v25  ;;  %v3031_v44 = vpack.c.bf16 %v2164_v21, %v2162_v9 }
 0x885   :  { %v1851_v45 = vpop.f32.mrb[14].mxu0  ;;  %v1922_v55 = vpop.f32.mrb[14].mxu1 }
 0x886   :  { %v3065_v56 = vadd.f32 %v1851_v45, %v3677_v42  ;;  %v1853_v63 = vpop.f32.mrb[15].mxu0  ;;  %v1924_v1 = vpop.f32.mrb[15].mxu1  ;;  %v3083_v23 = vadd.f32 %v1922_v55, %v3687_v10  ;;  %v3033_v45 = vpack.c.bf16 %v2169_v32, %v2167_v31  ;;  %v2166_v55 = vld [vmem:[#allocation12 + $0x80] sm:$0xff] }
 0x887   :  { %v3066_v7 = vadd.f32 %v1853_v63, %v3681_v43  ;;  %v3084_v15 = vadd.f32 %v1924_v1, %v3689_v12  ;;  %v2171_v63 = vld [vmem:[#allocation12 + $0xa8] sm:$0xff]  ;;  %v2173_v1 = vld [vmem:[#allocation12 + $0xb8] sm:$0xff] }
 0x888   :  { %v2371_v8 = vmul.f32 -1.442695, %v3065_v56  ;;  %v2168_v56 = vld [vmem:[#allocation12 + $0x90] sm:$0xff] }
 0x889   :  { %v2372_v14 = vmul.f32 -1.442695, %v3066_v7  ;;  %v2373_v22 = vmul.f32 -1.442695, %v3084_v15  ;;  %v3035_v7 = vpack.c.bf16 %v2168_v56, %v2166_v55  ;;  %v2172_v15 = vld [vmem:[#allocation12 + $0xb0] sm:$0xff] }
 0x88a   :  { %3245 = vpow2.f32 %v2371_v8  ;;  %v3037_v8 = vpack.c.bf16 %v2173_v1, %v2171_v63 }
 0x88b   :  { %3247 = vpow2.f32 %v2372_v14  ;;  %v2170_v14 = vld [vmem:[#allocation12 + $0xa0] sm:$0xff] }
 0x88c   :  { %3249 = vpow2.f32 %v2373_v22  ;;  %v2175_v22 = vld [vmem:[#allocation12 + $0xc8] sm:$0xff] }
 0x88d   :  { %3251 = vtanh.f32 %v3083_v23  ;;  %v2177_v23 = vld [vmem:[#allocation12 + $0xd8] sm:$0xff] }
 0x894   :  { %v3246_v29 = vpop.eup %3245 }
 0x895   :  { %v3248_v38 = vpop.eup %3247  ;;  %v1934_v39 = vadd.f32 1.0, %v3246_v29  ;;  %v3039_v29 = vpack.c.bf16 %v2172_v15, %v2170_v14 }
 0x896   :  { %v1940_v46 = vadd.f32 1.0, %v3248_v38  ;;  %v3250_v47 = vpop.eup %3249  ;;  %v3041_v38 = vpack.c.bf16 %v2177_v23, %v2175_v22 }
 0x897   :  { %3253 = vrcp.f32 %v1934_v39  ;;  %v3252_v52 = vpop.eup %3251  ;;  %v1947_v5 = vadd.f32 1.0, %v3250_v47  ;;  %v2174_v39 = vld [vmem:[#allocation12 + $0xc0] sm:$0xff]  ;;  %v2179_v47 = vld [vmem:[#allocation12 + $0xe8] sm:$0xff] }
 0x898   :  { %3255 = vrcp.f32 %v1940_v46  ;;  %v2176_v46 = vld [vmem:[#allocation12 + $0xd0] sm:$0xff] }
 0x899   :  { %3257 = vrcp.f32 %v1947_v5  ;;  %v2180_v5 = vld [vmem:[#allocation12 + $0xf0] sm:$0xff] }
 0x8a1   :  { %v3254_v53 = vpop.eup %3253 }
 0x8a2   :  { %v3256_v60 = vpop.eup %3255  ;;  %v1952_v61 = vmul.f32 %v3254_v53, %v3252_v52  ;;  %v2181_v52 = vld [vmem:[#allocation12 + $0xf8] sm:$0xff]  ;;  %v3043_v53 = vpack.c.bf16 %v2176_v46, %v2174_v39 }
 0x8a3   :  { %v1951_v6 = vmul.f32 %v3256_v60, %v3969_v17  ;;  %v3258_v59 = vpop.eup %3257  ;;  %v3029_v17 = vpack.c.bf16 %v2165_v58, %v2163_v35  ;;  %v3045_v60 = vpack.c.bf16 %v2181_v52, %v2179_v47 }
 0x8a5   :  { %v4013_v13 = vadd.f32 %v1952_v61, %v1951_v6  ;;  %v2178_v61 = vld [vmem:[#allocation12 + $0xe0] sm:$0xff] }
 0x8a6   :  { %v3047_v6 = vpack.c.bf16 %v2180_v5, %v2178_v61 }
 0x8a7   :  { %3259 = vtanh.f32 %v4013_v13 }
 0x8b1   :  { %v3260_v33 = vpop.eup %3259 }
 0x8b2   :  { %v4016_v27 = vmul.f32 %v3260_v33, %v3258_v59 }
 0x8b4   :  { %2031 = vmatmul.mubr.f32.vlgmr.msra.gmra.mrb[16].mxu0 %v4016_v27  ;;  %2102 = vmatmul.mubr.f32.vlgmr.msra.gmra.mrb[16].mxu1 %v4016_v27 }
 0x8b5   :  { %3020 = vmatpush1.bf16.msra.mxu0 %v3019_v34  ;;  %2258 = vmatprep.mubr.f32.mxu0 %v3405_v0 }
 0x8b6   :  { %3022 = vmatprep.subr.bf16.mxu0 %v3021_v48 }
 0x8b9   :  { %3024 = vmatpush1.bf16.msra.mxu0 %v3023_v54 }
 0x8ba   :  { %3026 = vmatprep.subr.bf16.mxu0 %v3025_v62 }
 0x8bd   :  { %3028 = vmatpush1.bf16.msra.mxu0 %v3027_v18 }
 0x8be   :  { %3030 = vmatprep.subr.bf16.mxu0 %v3029_v17 }
 0x8c1   :  { %3032 = vmatpush1.bf16.msra.mxu0 %v3031_v44 }
 0x8c2   :  { %3034 = vmatprep.subr.bf16.mxu0 %v3033_v45 }
 0x8c5   :  { %3036 = vmatpush1.bf16.msra.mxu0 %v3035_v7 }
 0x8c6   :  { %3038 = vmatprep.subr.bf16.mxu0 %v3037_v8 }
 0x8c9   :  { %3040 = vmatpush1.bf16.msra.mxu0 %v3039_v29 }
 0x8ca   :  { %3042 = vmatprep.subr.bf16.mxu0 %v3041_v38 }
 0x8cd   :  { %3044 = vmatpush1.bf16.msra.mxu0 %v3043_v53 }
 0x8ce   :  { %3046 = vmatprep.subr.bf16.mxu0 %v3045_v60 }
 0x8d1   :  { %3048 = vmatpush1.bf16.msra.mxu0 %v3047_v6 }
 0x8d4   :  { %2259 = vmatmul.mubr.f32.vlgmr.msra.gmra.mrb[18].mxu0 %v3696_v57 }
 0x8d5   :  { %2264 = vmatprep.mubr.f32.mxu0 %v3405_v0 }
 0x8d8   :  { %2265 = vmatmul.mubr.f32.gmra.mrb[20].mxu0 %v3742_v2 }
 0x8d9   :  { %2270 = vmatprep.mubr.f32.mxu0 %v3405_v0 }
 0x8dc   :  { %2271 = vmatmul.mubr.f32.gmra.mrb[22].mxu0 %v3788_v11 }
 0x8dd   :  { %2276 = vmatprep.mubr.f32.mxu0 %v3405_v0 }
 0x8e0   :  { %2277 = vmatmul.mubr.f32.gmra.mrb[24].mxu0 %v3834_v26 }
 0x8e1   :  { %2282 = vmatprep.mubr.f32.mxu0 %v3405_v0 }
 0x8e4   :  { %2283 = vmatmul.mubr.f32.gmra.mrb[26].mxu0 %v3880_v49 }
 0x8e5   :  { %2288 = vmatprep.mubr.f32.mxu0 %v3405_v0 }
 0x8e8   :  { %2289 = vmatmul.mubr.f32.gmra.mrb[28].mxu0 %v3926_v3 }
 0x8e9   :  { %2294 = vmatprep.mubr.f32.mxu0 %v3405_v0 }
 0x8ec   :  { %2295 = vmatmul.mubr.f32.gmra.mrb[30].mxu0 %v3972_v4 }
 0x8ed   :  { %2300 = vmatprep.mubr.f32.mxu0 %v3405_v0 }
 0x8f0   :  { %2301 = vmatmul.mubr.f32.gmra.mrb[32].mxu0 %v4016_v27 }
 0x8f1   :  { %2306 = vmatprep.mubr.f32.mxu0 %v3405_v0 }
 0x987   :  { %v2032_v57 = vpop.f32.mrb[16].mxu0  ;;  %v2103_v2 = vpop.f32.mrb[16].mxu1 }
 0x988   :  { %v3067_v11 = vadd.f32 %v2032_v57, %v3677_v42  ;;  %v2034_v26 = vpop.f32.mrb[17].mxu0  ;;  %v2105_v49 = vpop.f32.mrb[17].mxu1  ;;  %v3085_v28 = vadd.f32 %v2103_v2, %v3687_v10 }
 0x989   :  { %v3068_v16 = vadd.f32 %v2034_v26, %v3681_v43  ;;  %v3086_v4 = vadd.f32 %v2105_v49, %v3689_v12  ;;  %v2182_v43 = vld [vmem:[%s4069_s5] sm:$0x3]  ;;  %s3406_s5 = smov [#allocation14]  }
 0x98a   :  { %v2374_v24 = vmul.f32 -1.442695, %v3067_v11  ;;  %v2187_v10 = vrot.slane %v2182_v43, %v156_v37  ;;  %v2191_v51 = vrot.slane %v2182_v43, %v160_v41  ;;  %s2336_s25 = sshll.u32 %s3406_s5, 4  ;;  %s2337_s25 = int_to_ptr.vmem [resolvable:$true] %s2336_s25 }
 0x98b   :  { %v2375_v3 = vmul.f32 -1.442695, %v3068_v16  ;;  %v2376_v25 = vmul.f32 -1.442695, %v3086_v4  ;;  %s3365_s26 = scalar_lea.vmem %s2337_s25, 2304  ;;  %p3370_p5 = scmp.lt.s32.totalorder %s2337_s25, %s2337_s25 }
 0x98c   :  { %3261 = vpow2.f32 %v2374_v24  ;;  %p3366_p4 = scmp.ne.s32.totalorder %s2337_s25, %s3365_s26  ;;  %p3371_p6 = scmp.lt.s32.totalorder %s3365_s26, %s3365_s26 }
 0x98d   :  { %3263 = vpow2.f32 %v2375_v3 }
 0x98e   :  { %3265 = vpow2.f32 %v2376_v25  ;;  %p3372_p7 = por %p3371_p6, %p3370_p5 }
 0x98f   :  { %3267 = vtanh.f32 %v3085_v28 }
 0x990   :  { %p3373_p8 = pnand %p3372_p7, %p3366_p4 }
 0x996   :  { %v3262_v59 = vpop.eup %3261 }
 0x997   :  { %v3264_v33 = vpop.eup %3263  ;;  %v2115_v0 = vadd.f32 1.0, %v3262_v59 }
 0x998   :  { %v2121_v34 = vadd.f32 1.0, %v3264_v33  ;;  %v3266_v42 = vpop.eup %3265 }
 0x999   :  { %3269 = vrcp.f32 %v2115_v0  ;;  %v3268_v27 = vpop.eup %3267  ;;  %v2128_v19 = vadd.f32 1.0, %v3266_v42 }
 0x99a   :  { %3271 = vrcp.f32 %v2121_v34 }
 0x99b   :  { %3273 = vrcp.f32 %v2128_v19 }
 0x9a3   :  { %v3270_v48 = vpop.eup %3269 }
 0x9a4   :  { %v3272_v20 = vpop.eup %3271  ;;  %v2133_v12 = vmul.f32 %v3270_v48, %v3268_v27 }
 0x9a5   :  { %v2132_v30 = vmul.f32 %v3272_v20, %v4013_v13  ;;  %v3274_v41 = vpop.eup %3273 }
 0x9a7   :  { %v2260_v54 = vpop.f32.mrb[18].mxu0  ;;  %v2134_v62 = vadd.f32 %v2133_v12, %v2132_v30 }
 0x9a8   :  { %v2261_v40 = vadd.f32 %v2260_v54, %v2187_v10  ;;  %v2262_v50 = vpop.f32.mrb[19].mxu0 }
 0x9a9   :  { %v2263_v35 = vadd.f32 %v2262_v50, %v2191_v51  ;;  %3275 = vtanh.f32 %v2134_v62 }
 0x9aa   :  { %2313 = vst [vmem:[#allocation14] sm:$0xff] %v2261_v40 }
 0x9ab   :  { %2314 = vst [vmem:[#allocation14 + $0x8] sm:$0xff] %v2263_v35  ;;  %v2266_v58 = vpop.f32.mrb[20].mxu0 }
 0x9ac   :  { %v2267_v18 = vadd.f32 %v2266_v58, %v2187_v10  ;;  %v2268_v17 = vpop.f32.mrb[21].mxu0 }
 0x9ad   :  { %v2269_v9 = vadd.f32 %v2268_v17, %v2191_v51 }
 0x9ae   :  { %2315 = vst [vmem:[#allocation14 + $0x10] sm:$0xff] %v2267_v18 }
 0x9af   :  { %2316 = vst [vmem:[#allocation14 + $0x18] sm:$0xff] %v2269_v9  ;;  %v2272_v37 = vpop.f32.mrb[22].mxu0 }
 0x9b0   :  { %v2273_v13 = vadd.f32 %v2272_v37, %v2187_v10  ;;  %v2274_v21 = vpop.f32.mrb[23].mxu0 }
 0x9b1   :  { %v2275_v36 = vadd.f32 %v2274_v21, %v2191_v51 }
 0x9b2   :  { %2317 = vst [vmem:[#allocation14 + $0x20] sm:$0xff] %v2273_v13 }
 0x9b3   :  { %v3276_v31 = vpop.eup %3275  ;;  %2318 = vst [vmem:[#allocation14 + $0x28] sm:$0xff] %v2275_v36  ;;  %v2278_v32 = vpop.f32.mrb[24].mxu0 }
 0x9b4   :  { %v2279_v44 = vadd.f32 %v2278_v32, %v2187_v10  ;;  %v2280_v45 = vpop.f32.mrb[25].mxu0  ;;  %v2136_v55 = vmul.f32 %v3276_v31, %v3274_v41 }
 0x9b5   :  { %v2281_v56 = vadd.f32 %v2280_v45, %v2191_v51 }
 0x9b6   :  { %2319 = vst [vmem:[#allocation14 + $0x30] sm:$0xff] %v2279_v44  ;;  %2307 = vmatmul.mubr.f32.gmra.mrb[34].mxu0 %v2136_v55 }
 0x9b7   :  { %2320 = vst [vmem:[#allocation14 + $0x38] sm:$0xff] %v2281_v56  ;;  %v2284_v63 = vpop.f32.mrb[26].mxu0 }
 0x9b8   :  { %v2285_v1 = vadd.f32 %v2284_v63, %v2187_v10  ;;  %v2286_v7 = vpop.f32.mrb[27].mxu0 }
 0x9b9   :  { %v2287_v8 = vadd.f32 %v2286_v7, %v2191_v51 }
 0x9ba   :  { %2321 = vst [vmem:[#allocation14 + $0x40] sm:$0xff] %v2285_v1 }
 0x9bb   :  { %2322 = vst [vmem:[#allocation14 + $0x48] sm:$0xff] %v2287_v8  ;;  %v2290_v14 = vpop.f32.mrb[28].mxu0 }
 0x9bc   :  { %v2291_v15 = vadd.f32 %v2290_v14, %v2187_v10  ;;  %v2292_v22 = vpop.f32.mrb[29].mxu0 }
 0x9bd   :  { %v2293_v23 = vadd.f32 %v2292_v22, %v2191_v51 }
 0x9be   :  { %2323 = vst [vmem:[#allocation14 + $0x50] sm:$0xff] %v2291_v15 }
 0x9bf   :  { %2324 = vst [vmem:[#allocation14 + $0x58] sm:$0xff] %v2293_v23  ;;  %v2296_v29 = vpop.f32.mrb[30].mxu0 }
 0x9c0   :  { %v2297_v38 = vadd.f32 %v2296_v29, %v2187_v10  ;;  %v2298_v39 = vpop.f32.mrb[31].mxu0 }
 0x9c1   :  { %v2299_v46 = vadd.f32 %v2298_v39, %v2191_v51 }
 0x9c2   :  { %2325 = vst [vmem:[#allocation14 + $0x60] sm:$0xff] %v2297_v38 }
 0x9c3   :  { %2326 = vst [vmem:[#allocation14 + $0x68] sm:$0xff] %v2299_v46  ;;  %v2302_v47 = vpop.f32.mrb[32].mxu0 }
 0x9c4   :  { %v2303_v52 = vadd.f32 %v2302_v47, %v2187_v10  ;;  %v2304_v53 = vpop.f32.mrb[33].mxu0 }
 0x9c5   :  { %v2305_v60 = vadd.f32 %v2304_v53, %v2191_v51 }
 0x9c6   :  { %2327 = vst [vmem:[#allocation14 + $0x70] sm:$0xff] %v2303_v52 }
 0x9c7   :  { %2328 = vst [vmem:[#allocation14 + $0x78] sm:$0xff] %v2305_v60 }
 0xa89   :  { %v2308_v61 = vpop.f32.mrb[34].mxu0 }
 0xa8a   :  { %v2309_v5 = vadd.f32 %v2308_v61, %v2187_v10  ;;  %v2310_v6 = vpop.f32.mrb[35].mxu0 }
 0xa8b   :  { %v2311_v57 = vadd.f32 %v2310_v6, %v2191_v51 }
 0xa8c   :  { %2329 = vst [vmem:[#allocation14 + $0x80] sm:$0xff] %v2309_v5 }
 0xa8d   :  { %2330 = vst [vmem:[#allocation14 + $0x88] sm:$0xff] %v2311_v57 }
 0xa8e   :  { %3376 = shalt.err (!%p3373_p8)
}
 0xa8f   :  { %s3377_s29 = scalar_lea.hbm %s4070_s6, 2304 }
 0xa90   :  { %p3378_p9 = scmp.ne.s32.totalorder %s4070_s6, %s3377_s29  ;;  %p3381_p10 = scmp.lt.u32.totalorder %s3377_s29, %s4070_s6 }
 0xa92   :  { %p3383_p11 = pnand %p3381_p10, %p3378_p9 }
 0xa94   :  { %3386 = shalt.err (!%p3383_p11)
}
 0xa95   :  { %2342 = dma.vmem_to_hbm [thread:$0]  %s2337_s25, 2304, %s4070_s6, [#allocation8], %s3403_s2, %s3403_s2, %s3404_s7  }
 0xa96   :  { %3393 = dma.done.wait [#allocation8], 2304  }
 0xa97   :  { %3394 = vsyncadd [#allocation8], 4294964992 }
 0xa98   :  { %2346 = vsyncpa [#allocation7], 1 }
 0xa99   :  { %2347 = vsyncpa [#allocation10], 1 }
 0xa9a   :  { %2348 = vsyncpa [#allocation13], 1 }
 0xa9b   :  { %2349 = vsyncpa [#allocation8], 1 }

</bundles_post_ra>
